<compile_context>
chip_gen: v7x
topology: tpu7x:2x2x1
jax: 0.10.0
libtpu: 0.0.40
codegen_flags: <defaults>
</compile_context>

<pallas_src>
import math

import jax
import jax.numpy as jnp
from jax import lax
from jax.experimental import pallas as pl
from jax.experimental.pallas import tpu as pltpu

_LANE = 128                               # TPU lane width
_SUBLANE = 8                              # f32 sublanes per vreg
_SAMPLES_PER_ROW = _LANE // 2             # 64: one 128-lane row = 64 (x0, x1) pairs
_MIN_BLOCK_B = _SAMPLES_PER_ROW * _SUBLANE        # 512 samples -> (8, 128) minimum block
_CHUNK_ROWS = 256                         # in-kernel compute chunk: (256,128) f32 = 128 KiB
_CHUNK_B = _SAMPLES_PER_ROW * _CHUNK_ROWS         # 16384 samples per compute chunk
_MAX_BLOCK_B = 256 * 1024                 # ~3 MB HBM per grid step (near roofline-saturating)
_TARGET_STEPS = 8                         # keep a few steps so double-buffering overlaps
_HIDDEN = 4


def _round_up(x, m):
    return (x + m - 1) // m * m


def _choose_block(batch):
    """Lane/sublane-aligned batch block: ~_TARGET_STEPS grid steps, capped for VMEM."""
    tb = _round_up(-(-batch // _TARGET_STEPS), _MIN_BLOCK_B)
    tb = max(_MIN_BLOCK_B, min(tb, _MAX_BLOCK_B))
    if tb > _CHUNK_B:                      # keep whole chunks per block
        tb = min(_round_up(tb, _CHUNK_B), _MAX_BLOCK_B)
    return tb


def _mlp_kernel(w1_ref, b1_ref, w2_ref, b2_ref, x_ref, o_ref):
    # x_ref: (R, 128) f32 tile of the feature-interleaved input:
    #   lane 2s   = feature 0 of sample (row*64 + s)
    #   lane 2s+1 = feature 1 of the same sample
    # o_ref: (R, 64) f32 tile; lane s = sigmoid output of sample (row*64 + s).
    # Params are flat SMEM scalars, resident across the grid:
    #   w1_ref (8,) indexed [out_j*2 + in_i], b1_ref (4,), w2_ref (4,), b2_ref (1,).
    rows = x_ref.shape[0]
    cr = min(_CHUNK_ROWS, rows)
    n_chunks = rows // cr                  # exact by construction in the wrapper

    # Built once per grid step (hoisted out of the chunk loop).
    # Selection matrices: (xi @ e0)[r, s] = xi[r, 2s] (feature 0), e1 -> feature 1.
    r_idx = lax.broadcasted_iota(jnp.int32, (_LANE, _SAMPLES_PER_ROW), 0)
    c_idx = lax.broadcasted_iota(jnp.int32, (_LANE, _SAMPLES_PER_ROW), 1)
    e0 = (r_idx == 2 * c_idx).astype(jnp.float32)
    e1 = (r_idx == 2 * c_idx + 1).astype(jnp.float32)
    # Fold W1 into the selection matrices -> layer 1 (deinterleave + FMAs) on the MXU.
    f_mats = [w1_ref[2 * j] * e0 + w1_ref[2 * j + 1] * e1 for j in range(_HIDDEN)]

    def chunk(c, carry):
        r0 = pl.multiple_of(c * cr, cr)
        xi = x_ref[pl.ds(r0, cr), :]                       # (cr, 128) dense f32 tile
        acc = None
        for j in range(_HIDDEN):                           # 4 hidden units, unrolled
            h = jnp.dot(xi, f_mats[j],                     # layer-1 on the idle MXU
                        precision=lax.Precision.HIGHEST,
                        preferred_element_type=jnp.float32) + b1_ref[j]
            h = jnp.maximum(h, 0.0)                        # ReLU (VPU)
            t = w2_ref[j] * h                              # layer-2 scalar FMAs (VPU)
            acc = t if acc is None else acc + t
        z = acc + b2_ref[0]                                # (cr, 64) logits
        o_ref[pl.ds(r0, cr), :] = 1.0 / (1.0 + jnp.exp(-z))  # Sigmoid (EUP exp path)
        return carry

    lax.fori_loop(0, n_chunks, chunk, 0)


def mlp_forward(x, w1, b1, w2, b2):
    """x: (B, 2) f32; w1: (2, 4); b1: (1, 4); w2: (4, 1); b2: (1, 1) -> (B, 1) f32.

    Weights are stored (in_features, out_features), i.e. transposed vs PyTorch, so
    the computation is y = sigmoid(relu(x @ w1 + b1) @ w2 + b2).
    """
    batch = x.shape[0]
    assert x.shape[1] == 2

    tb = _choose_block(batch)
    bp = _round_up(batch, tb)
    xp = x if bp == batch else jnp.pad(x, ((0, bp - batch), (0, 0)))
    # Contiguous (free) reshape: row r holds 64 consecutive samples, features
    # interleaved on lanes.  No transpose / extra HBM pass in the wrapper.
    xi = xp.reshape(bp // _SAMPLES_PER_ROW, _LANE)
    rows_per_block = tb // _SAMPLES_PER_ROW

    # Flatten the 17 parameters into tiny 1-D SMEM-resident arrays.
    w1f = jnp.transpose(w1).reshape(-1).astype(jnp.float32)   # (8,)  [out_j*2 + in_i]
    b1f = b1.reshape(-1).astype(jnp.float32)                  # (4,)
    w2f = w2.reshape(-1).astype(jnp.float32)                  # (4,)
    b2f = b2.reshape(-1).astype(jnp.float32)                  # (1,)

    out = pl.pallas_call(
        _mlp_kernel,
        out_shape=jax.ShapeDtypeStruct(
            (bp // _SAMPLES_PER_ROW, _SAMPLES_PER_ROW), jnp.float32),
        grid=(bp // tb,),
        in_specs=[
            pl.BlockSpec(memory_space=pltpu.MemorySpace.SMEM),   # w1 scalars (resident)
            pl.BlockSpec(memory_space=pltpu.MemorySpace.SMEM),   # b1
            pl.BlockSpec(memory_space=pltpu.MemorySpace.SMEM),   # w2
            pl.BlockSpec(memory_space=pltpu.MemorySpace.SMEM),   # b2
            pl.BlockSpec((rows_per_block, _LANE), lambda i: (i, 0)),          # x tile
        ],
        out_specs=pl.BlockSpec((rows_per_block, _SAMPLES_PER_ROW), lambda i: (i, 0)),
        compiler_params=pltpu.CompilerParams(
            dimension_semantics=("parallel",),        # v7x: shard blocks across the 2 TCs
            vmem_limit_bytes=32 * 1024 * 1024,        # explicit budget (v5e default is 16 MiB)
        ),
    )(w1f, b1f, w2f, b2f, xi)

    y = out.reshape(bp, 1)                            # contiguous -> free
    return y if bp == batch else y[:batch]


def init_params(key):
    """Deterministic init mimicking PyTorch nn.Linear default U(-1/sqrt(fan_in), ...)."""
    k1, k2, k3, k4 = jax.random.split(key, 4)
    bound1 = 1.0 / math.sqrt(2.0)
    bound2 = 1.0 / math.sqrt(4.0)
    w1 = jax.random.uniform(k1, (2, 4), jnp.float32, -bound1, bound1)
    b1 = jax.random.uniform(k2, (1, 4), jnp.float32, -bound1, bound1)
    w2 = jax.random.uniform(k3, (4, 1), jnp.float32, -bound2, bound2)
    b2 = jax.random.uniform(k4, (1, 1), jnp.float32, -bound2, bound2)
    return w1, b1, w2, b2


def mlp_reference(x, w1, b1, w2, b2):
    h = jnp.maximum(jnp.dot(x, w1, precision=lax.Precision.HIGHEST) + b1, 0.0)
    return jax.nn.sigmoid(jnp.dot(h, w2, precision=lax.Precision.HIGHEST) + b2)


if __name__ == "__main__":
    key = jax.random.PRNGKey(0)
    kx, kp = jax.random.split(key)
    x = jax.random.normal(kx, (8, 2), jnp.float32)      # batch=8, in_features=2
    w1, b1, w2, b2 = init_params(kp)

    out = jax.block_until_ready(mlp_forward(x, w1, b1, w2, b2))
    ref = mlp_reference(x, w1, b1, w2, b2)

    assert out.shape == (8, 1)
    assert jnp.allclose(out, ref, atol=1e-5, rtol=1e-5), (out, ref)
    print("KERNEL_OK")
</pallas_src>

<mosaic_0001>
module attributes {stable_mosaic.version = 11 : i64} {
  func.func @_mlp_kernel(%arg0: i32, %arg1: memref<8xf32, #tpu.memory_space<smem>>, %arg2: memref<4xf32, #tpu.memory_space<smem>>, %arg3: memref<4xf32, #tpu.memory_space<smem>>, %arg4: memref<1xf32, #tpu.memory_space<smem>>, %arg5: memref<8x128xf32, #tpu.memory_space<vmem>>, %arg6: memref<8x64xf32, #tpu.memory_space<vmem>>) attributes {dimension_semantics = [#tpu.dimension_semantics<parallel>], iteration_bounds = array<i64: 1>, scalar_prefetch = 0 : i64, scratch_operands = 0 : i64, tpu.core_type = #tpu.core_type<tc>, window_params = [{transform_indices = @transform_0, window_bounds = array<i64: 8>}, {transform_indices = @transform_1, window_bounds = array<i64: 4>}, {transform_indices = @transform_2, window_bounds = array<i64: 4>}, {transform_indices = @transform_3, window_bounds = array<i64: 1>}, {transform_indices = @transform_4, window_bounds = array<i64: 8, 128>}, {transform_indices = @transform_5, window_bounds = array<i64: 8, 64>}]} {
    %0 = tpu.iota {dimensions = array<i32: 0>} : vector<128x64xi32>
    %1 = tpu.iota {dimensions = array<i32: 1>} : vector<128x64xi32>
    %c2_i32 = arith.constant 2 : i32
    %2 = vector.broadcast %c2_i32 : i32 to vector<128x64xi32>
    %3 = arith.muli %2, %1 : vector<128x64xi32>
    %4 = arith.cmpi eq, %0, %3 : vector<128x64xi32>
    %5 = arith.extui %4 : vector<128x64xi1> to vector<128x64xi32>
    %6 = arith.sitofp %5 : vector<128x64xi32> to vector<128x64xf32>
    %c2_i32_0 = arith.constant 2 : i32
    %7 = vector.broadcast %c2_i32_0 : i32 to vector<128x64xi32>
    %8 = arith.muli %7, %1 : vector<128x64xi32>
    %c1_i32 = arith.constant 1 : i32
    %9 = vector.broadcast %c1_i32 : i32 to vector<128x64xi32>
    %10 = arith.addi %8, %9 : vector<128x64xi32>
    %11 = arith.cmpi eq, %0, %10 : vector<128x64xi32>
    %12 = arith.extui %11 : vector<128x64xi1> to vector<128x64xi32>
    %13 = arith.sitofp %12 : vector<128x64xi32> to vector<128x64xf32>
    %c0 = arith.constant 0 : index
    %14 = memref.load %arg1[%c0] : memref<8xf32, #tpu.memory_space<smem>>
    %15 = vector.broadcast %14 : f32 to vector<128x64xf32>
    %16 = arith.mulf %15, %6 : vector<128x64xf32>
    %c1 = arith.constant 1 : index
    %17 = memref.load %arg1[%c1] : memref<8xf32, #tpu.memory_space<smem>>
    %18 = vector.broadcast %17 : f32 to vector<128x64xf32>
    %19 = arith.mulf %18, %13 : vector<128x64xf32>
    %20 = arith.addf %16, %19 : vector<128x64xf32>
    %c2 = arith.constant 2 : index
    %21 = memref.load %arg1[%c2] : memref<8xf32, #tpu.memory_space<smem>>
    %22 = vector.broadcast %21 : f32 to vector<128x64xf32>
    %23 = arith.mulf %22, %6 : vector<128x64xf32>
    %c3 = arith.constant 3 : index
    %24 = memref.load %arg1[%c3] : memref<8xf32, #tpu.memory_space<smem>>
    %25 = vector.broadcast %24 : f32 to vector<128x64xf32>
    %26 = arith.mulf %25, %13 : vector<128x64xf32>
    %27 = arith.addf %23, %26 : vector<128x64xf32>
    %c4 = arith.constant 4 : index
    %28 = memref.load %arg1[%c4] : memref<8xf32, #tpu.memory_space<smem>>
    %29 = vector.broadcast %28 : f32 to vector<128x64xf32>
    %30 = arith.mulf %29, %6 : vector<128x64xf32>
    %c5 = arith.constant 5 : index
    %31 = memref.load %arg1[%c5] : memref<8xf32, #tpu.memory_space<smem>>
    %32 = vector.broadcast %31 : f32 to vector<128x64xf32>
    %33 = arith.mulf %32, %13 : vector<128x64xf32>
    %34 = arith.addf %30, %33 : vector<128x64xf32>
    %c6 = arith.constant 6 : index
    %35 = memref.load %arg1[%c6] : memref<8xf32, #tpu.memory_space<smem>>
    %36 = vector.broadcast %35 : f32 to vector<128x64xf32>
    %37 = arith.mulf %36, %6 : vector<128x64xf32>
    %c7 = arith.constant 7 : index
    %38 = memref.load %arg1[%c7] : memref<8xf32, #tpu.memory_space<smem>>
    %39 = vector.broadcast %38 : f32 to vector<128x64xf32>
    %40 = arith.mulf %39, %13 : vector<128x64xf32>
    %41 = arith.addf %37, %40 : vector<128x64xf32>
    %c0_i32 = arith.constant 0 : i32
    %c8_i32 = arith.constant 8 : i32
    %42 = arith.muli %c0_i32, %c8_i32 : i32
    %43 = tpu.assume_multiple %42, 8 : i32
    %44 = arith.index_cast %43 : i32 to index
    %c0_1 = arith.constant 0 : index
    %45 = vector.load %arg5[%44, %c0_1] : memref<8x128xf32, #tpu.memory_space<vmem>>, vector<8x128xf32>
    %cst = arith.constant dense<0.000000e+00> : vector<8x64xf32>
    %46 = tpu.matmul %45, %20, %cst {dimension_numbers = #tpu.dot_dimension_numbers<[1], [0], [0], [1], [0, 0, 1, 1], [], []>, precision = #tpu.contract_precision<fp32>} : vector<8x128xf32>, vector<128x64xf32>, vector<8x64xf32> -> vector<8x64xf32>
    %c0_2 = arith.constant 0 : index
    %47 = memref.load %arg2[%c0_2] : memref<4xf32, #tpu.memory_space<smem>>
    %48 = vector.broadcast %47 : f32 to vector<8x64xf32>
    %49 = arith.addf %46, %48 : vector<8x64xf32>
    %cst_3 = arith.constant 0.000000e+00 : f32
    %50 = vector.broadcast %cst_3 : f32 to vector<8x64xf32>
    %51 = arith.maximumf %49, %50 : vector<8x64xf32>
    %c0_4 = arith.constant 0 : index
    %52 = memref.load %arg3[%c0_4] : memref<4xf32, #tpu.memory_space<smem>>
    %53 = vector.broadcast %52 : f32 to vector<8x64xf32>
    %54 = arith.mulf %53, %51 : vector<8x64xf32>
    %cst_5 = arith.constant dense<0.000000e+00> : vector<8x64xf32>
    %55 = tpu.matmul %45, %27, %cst_5 {dimension_numbers = #tpu.dot_dimension_numbers<[1], [0], [0], [1], [0, 0, 1, 1], [], []>, precision = #tpu.contract_precision<fp32>} : vector<8x128xf32>, vector<128x64xf32>, vector<8x64xf32> -> vector<8x64xf32>
    %c1_6 = arith.constant 1 : index
    %56 = memref.load %arg2[%c1_6] : memref<4xf32, #tpu.memory_space<smem>>
    %57 = vector.broadcast %56 : f32 to vector<8x64xf32>
    %58 = arith.addf %55, %57 : vector<8x64xf32>
    %cst_7 = arith.constant 0.000000e+00 : f32
    %59 = vector.broadcast %cst_7 : f32 to vector<8x64xf32>
    %60 = arith.maximumf %58, %59 : vector<8x64xf32>
    %c1_8 = arith.constant 1 : index
    %61 = memref.load %arg3[%c1_8] : memref<4xf32, #tpu.memory_space<smem>>
    %62 = vector.broadcast %61 : f32 to vector<8x64xf32>
    %63 = arith.mulf %62, %60 : vector<8x64xf32>
    %64 = arith.addf %54, %63 : vector<8x64xf32>
    %cst_9 = arith.constant dense<0.000000e+00> : vector<8x64xf32>
    %65 = tpu.matmul %45, %34, %cst_9 {dimension_numbers = #tpu.dot_dimension_numbers<[1], [0], [0], [1], [0, 0, 1, 1], [], []>, precision = #tpu.contract_precision<fp32>} : vector<8x128xf32>, vector<128x64xf32>, vector<8x64xf32> -> vector<8x64xf32>
    %c2_10 = arith.constant 2 : index
    %66 = memref.load %arg2[%c2_10] : memref<4xf32, #tpu.memory_space<smem>>
    %67 = vector.broadcast %66 : f32 to vector<8x64xf32>
    %68 = arith.addf %65, %67 : vector<8x64xf32>
    %cst_11 = arith.constant 0.000000e+00 : f32
    %69 = vector.broadcast %cst_11 : f32 to vector<8x64xf32>
    %70 = arith.maximumf %68, %69 : vector<8x64xf32>
    %c2_12 = arith.constant 2 : index
    %71 = memref.load %arg3[%c2_12] : memref<4xf32, #tpu.memory_space<smem>>
    %72 = vector.broadcast %71 : f32 to vector<8x64xf32>
    %73 = arith.mulf %72, %70 : vector<8x64xf32>
    %74 = arith.addf %64, %73 : vector<8x64xf32>
    %cst_13 = arith.constant dense<0.000000e+00> : vector<8x64xf32>
    %75 = tpu.matmul %45, %41, %cst_13 {dimension_numbers = #tpu.dot_dimension_numbers<[1], [0], [0], [1], [0, 0, 1, 1], [], []>, precision = #tpu.contract_precision<fp32>} : vector<8x128xf32>, vector<128x64xf32>, vector<8x64xf32> -> vector<8x64xf32>
    %c3_14 = arith.constant 3 : index
    %76 = memref.load %arg2[%c3_14] : memref<4xf32, #tpu.memory_space<smem>>
    %77 = vector.broadcast %76 : f32 to vector<8x64xf32>
    %78 = arith.addf %75, %77 : vector<8x64xf32>
    %cst_15 = arith.constant 0.000000e+00 : f32
    %79 = vector.broadcast %cst_15 : f32 to vector<8x64xf32>
    %80 = arith.maximumf %78, %79 : vector<8x64xf32>
    %c3_16 = arith.constant 3 : index
    %81 = memref.load %arg3[%c3_16] : memref<4xf32, #tpu.memory_space<smem>>
    %82 = vector.broadcast %81 : f32 to vector<8x64xf32>
    %83 = arith.mulf %82, %80 : vector<8x64xf32>
    %84 = arith.addf %74, %83 : vector<8x64xf32>
    %c0_17 = arith.constant 0 : index
    %85 = memref.load %arg4[%c0_17] : memref<1xf32, #tpu.memory_space<smem>>
    %86 = vector.broadcast %85 : f32 to vector<8x64xf32>
    %87 = arith.addf %84, %86 : vector<8x64xf32>
    %cst_18 = arith.constant 0.000000e+00 : f32
    %88 = vector.broadcast %cst_18 : f32 to vector<8x64xf32>
    %89 = arith.subf %88, %87 : vector<8x64xf32>
    %90 = math.exp %89 : vector<8x64xf32>
    %cst_19 = arith.constant 1.000000e+00 : f32
    %91 = vector.broadcast %cst_19 : f32 to vector<8x64xf32>
    %92 = arith.addf %91, %90 : vector<8x64xf32>
    %cst_20 = arith.constant 1.000000e+00 : f32
    %93 = vector.broadcast %cst_20 : f32 to vector<8x64xf32>
    %94 = arith.divf %93, %92 : vector<8x64xf32>
    %95 = arith.index_cast %43 : i32 to index
    %c0_21 = arith.constant 0 : index
    %96 = vector.load %arg6[%95, %c0_21] : memref<8x64xf32, #tpu.memory_space<vmem>>, vector<8x64xf32>
    tpu.vector_store %arg6[%95, %c0_21], %94 {strides = array<i32>} : memref<8x64xf32, #tpu.memory_space<vmem>>, vector<8x64xf32>,
    %c1_i32_22 = arith.constant 1 : i32
    return
  }
  func.func @transform_0(%arg0: i32) -> i32 {
    %c0_i32 = arith.constant 0 : i32
    %c0_i32_0 = arith.constant 0 : i32
    return %c0_i32 : i32
  }
  func.func @transform_1(%arg0: i32) -> i32 {
    %c0_i32 = arith.constant 0 : i32
    %c0_i32_0 = arith.constant 0 : i32
    return %c0_i32 : i32
  }
  func.func @transform_2(%arg0: i32) -> i32 {
    %c0_i32 = arith.constant 0 : i32
    %c0_i32_0 = arith.constant 0 : i32
    return %c0_i32 : i32
  }
  func.func @transform_3(%arg0: i32) -> i32 {
    %c0_i32 = arith.constant 0 : i32
    %c0_i32_0 = arith.constant 0 : i32
    return %c0_i32 : i32
  }
  func.func @transform_4(%arg0: i32) -> (i32, i32) {
    %c0_i32 = arith.constant 0 : i32
    %c0_i32_0 = arith.constant 0 : i32
    return %arg0, %c0_i32 : i32, i32
  }
  func.func @transform_5(%arg0: i32) -> (i32, i32) {
    %c0_i32 = arith.constant 0 : i32
    %c0_i32_0 = arith.constant 0 : i32
    return %arg0, %c0_i32 : i32, i32
  }
}

</mosaic_0001>

<bundles_post_ra>
// kernel: tpu_custom_call.1
= control target key start
LH: loop header
LB: loop body
LE: loop exit
PB: predicated region body
PF: predicated region fallthrough
CT: control target
= control target key end

     0   :  { %11 = vsyncpa [#allocation5], 0  ;;  %s6633_s0 = inlined_call_operand.vmem [shape: f32[8], index: 0, kind: input, shape index: {}]   ;;  %s6634_s1 = inlined_call_operand.vmem [shape: f32[4], index: 1, kind: input, shape index: {}]   ;;  %s6635_s2 = inlined_call_operand.vmem [shape: f32[4], index: 2, kind: input, shape index: {}]   ;;  %s6636_s3 = inlined_call_operand.<no memory space> [shape: f32[1], index: 3, kind: input, shape index: {}]   ;;  %s6637_s4 = inlined_call_operand.vmem [shape: f32[8,128], index: 4, kind: input, shape index: {}]   ;;  %s6638_s5 = inlined_call_operand.hbm [shape: f32[8,64], index: 5, kind: output, shape index: {}]  }
   0x1   :  { %12 = vsyncpa [#allocation7], 0  ;;  %s30_s20 = sshll.u32 %s6634_s1, 4  ;;  %s31_s20 = int_to_ptr.vmem [resolvable:$true] %s30_s20 }
   0x2   :  { %13 = vsyncpa [#allocation4], 0  ;;  %s20_s23 = sshll.u32 %s6633_s0, 4  ;;  %s4926_s24 = scalar_lea.vmem %s31_s20, 16  ;;  %s21_s23 = int_to_ptr.vmem [resolvable:$true] %s20_s23 }
   0x3   :  { %p4927_p0 = scmp.ne.s32.totalorder %s31_s20, %s4926_s24  ;;  %p4931_p1 = scmp.lt.s32.totalorder %s31_s20, %s31_s20 }
   0x4   :  { %p4932_p2 = scmp.lt.s32.totalorder %s4926_s24, %s4926_s24 }
   0x6   :  { %p4933_p3 = por %p4932_p2, %p4931_p1 }
   0x8   :  { %p4934_p4 = pnand %p4933_p3, %p4927_p0 }
   0xa   :  { %4937 = shalt.err (!%p4934_p4)
}
   0xb   :  { %s4990_s25 = smov [#allocation6]   ;;  %s4938_s26 = scalar_lea.vmem %s21_s23, 16 }
   0xc   :  { %33 = dma.vmem_to_smem %s31_s20, 16, %s4990_s25, [#allocation7]  }
   0xd   :  { %p4939_p5 = scmp.ne.s32.totalorder %s21_s23, %s4938_s26  ;;  %p4943_p6 = scmp.lt.s32.totalorder %s21_s23, %s21_s23 }
   0xe   :  { %p4944_p7 = scmp.lt.s32.totalorder %s4938_s26, %s4938_s26 }
  0x10   :  { %p4945_p8 = por %p4944_p7, %p4943_p6 }
  0x12   :  { %p4946_p9 = pnand %p4945_p8, %p4939_p5 }
  0x14   :  { %4949 = shalt.err (!%p4946_p9)
}
  0x15   :  { %s4991_s1 = smov [#allocation3]   ;;  %s40_s28 = sshll.u32 %s6635_s2, 4  ;;  %s41_s28 = int_to_ptr.vmem [resolvable:$true] %s40_s28 }
  0x16   :  { %23 = dma.vmem_to_smem %s21_s23, 16, %s4991_s1, [#allocation5]  }
  0x17   :  { %s4950_s29 = scalar_lea.vmem %s41_s28, 16  ;;  %p4955_p11 = scmp.lt.s32.totalorder %s41_s28, %s41_s28 }
  0x18   :  { %p4951_p10 = scmp.ne.s32.totalorder %s41_s28, %s4950_s29  ;;  %p4956_p12 = scmp.lt.s32.totalorder %s4950_s29, %s4950_s29 }
  0x1a   :  { %p4957_p13 = por %p4956_p12, %p4955_p11 }
  0x1c   :  { %p4958_p0 = pnand %p4957_p13, %p4951_p10 }
  0x1e   :  { %4961 = shalt.err (!%p4958_p0)
}
  0x1f   :  { %s4992_s30 = smov [#allocation8]  }
  0x20   :  { %43 = dma.vmem_to_smem %s41_s28, 16, %s4992_s30, [#allocation7]  }
  0x21   :  { %4984 = dma.done.wait [#allocation5], 16  }
  0x22   :  { %4985 = vsyncadd [#allocation5], 4294967280 }
  0x23   :  { %4986 = dma.done.wait [#allocation7], 32  }
  0x24   :  { %4987 = vsyncadd [#allocation7], 4294967264 }
  0x25   :  { %57 = sfence }
  0x26   :  { %v58_v0 = vlaneseq  ;;  %s175_s6 = sld [smem:[#allocation3]]  ;;  %s3034_s7 = sld [smem:[#allocation3 + $0x1]]  ;;  %v6655_v1 = vmov 0.0|0.0   ;;  %v5041_v2 = vld [vmem:[%s6637_s4] sm:$0xff]  ;;  %vm4994_vm0 = vmmov 0   ;;  %v6639_v5 = vmov 0.0  }
  0x27   :  { %4295 = vmatprep.subr.bf16.mxu0 %v6655_v1  ;;  %4439 = vmatprep.subr.bf16.mxu1 %v6655_v1  ;;  %s3035_s2 = sld [smem:[#allocation3 + $0x2]]  ;;  %s5045_s10 = sld [smem:[#allocation3 + $0x3]]  ;;  %v5052_v6 = vand.u32 4294901760, %v5041_v2 }
  0x28   :  { %v5043_v3 = vshrl.u32 %v58_v0, 7  ;;  %v76_v4 = vand.u32 127, %v58_v0  ;;  %3487 = vmatprep.mubr.msk.f32.mxu0 %vm4994_vm0, %v6639_v5  ;;  %3697 = vmatprep.mubr.msk.f32.mxu1 %vm4994_vm0, %v6639_v5  ;;  %s3037_s4 = sld [smem:[#allocation3 + $0x4]]  ;;  %s3038_s11 = sld [smem:[#allocation3 + $0x5]] }
  0x29   :  { %s3039_s12 = sld [smem:[#allocation3 + $0x6]]  ;;  %s3040_s13 = sld [smem:[#allocation3 + $0x7]] }
  0x2a   :  { %v60_v7 = vadd.s32 8, %v5043_v3  ;;  %v5055_v8 = vmul.u32 2, %v76_v4  ;;  %v61_v9 = vadd.s32 16, %v5043_v3  ;;  %v62_v10 = vadd.s32 24, %v5043_v3  ;;  %s384_s14 = sld [smem:[#allocation6]]  ;;  %s3041_s15 = sld [smem:[#allocation6 + $0x1]] }
  0x2b   :  { %v5060_v11 = vadd.s32 32, %v5043_v3  ;;  %v5063_v12 = vadd.s32 40, %v5043_v3  ;;  %v5066_v13 = vadd.s32 48, %v5043_v3  ;;  %v5069_v14 = vadd.s32 56, %v5043_v3  ;;  %s1028_s16 = sld [smem:[#allocation8]]  ;;  %s3042_s17 = sld [smem:[#allocation8 + $0x1]] }
  0x2c   :  { %vm78_vm1 = vcmp.eq.s32.totalorder %v5043_v3, %v5055_v8  ;;  %vm79_vm2 = vcmp.eq.s32.totalorder %v60_v7, %v5055_v8  ;;  %v5075_v15 = vadd.s32 1, %v5055_v8  ;;  %v5077_v16 = vstv %s175_s6  ;;  %s3043_s18 = sld [smem:[#allocation6 + $0x2]]  ;;  %s3045_s19 = sld [smem:[#allocation6 + $0x3]] }
  0x2d   :  { %v5080_v17 = vsel %vm78_vm1, 1.0, %v6639_v5  ;;  %v5083_v18 = vsel %vm79_vm2, 1.0, %v6639_v5  ;;  %v5085_v19 = vstv %s3034_s7  ;;  %v5087_v20 = vstv %s3035_s2  ;;  %s3044_s20 = sld [smem:[#allocation8 + $0x2]]  ;;  %s3046_s21 = sld [smem:[#allocation8 + $0x3]] }
  0x2e   :  { %6794 = vst [vmem:[#allocation13_spill] sm:$0xff] %v5080_v17  ;;  %6795 = vst [vmem:[#allocation14_spill] sm:$0xff] %v5083_v18  ;;  %vm127_vm3 = vcmp.eq.s32.totalorder %v5043_v3, %v5075_v15  ;;  %vm128_vm4 = vcmp.eq.s32.totalorder %v60_v7, %v5075_v15  ;;  %v177_v21 = vmul.f32 %v5080_v17, %v5077_v16  ;;  %v5111_v29 = vstv %s5045_s10  ;;  %s4996_s24 = smov [#allocation9]  }
  0x2f   :  { %v178_v22 = vmul.f32 %v5083_v18, %v5077_v16  ;;  %v5097_v23 = vsel %vm127_vm3, 1.0, %v6639_v5  ;;  %v5100_v24 = vsel %vm128_vm4, 1.0, %v6639_v5  ;;  %v229_v25 = vmul.f32 %v5080_v17, %v5087_v20  ;;  %s2992_s25 = sshll.u32 %s4996_s24, 4  ;;  %s2993_s25 = int_to_ptr.vmem [resolvable:$true] %s2992_s25 }
  0x30   :  { %6796 = vst [vmem:[#allocation15_spill] sm:$0xff] %v5097_v23  ;;  %6797 = vst [vmem:[#allocation16_spill] sm:$0xff] %v5100_v24  ;;  %v230_v26 = vmul.f32 %v5083_v18, %v5087_v20  ;;  %v195_v27 = vmul.f32 %v5097_v23, %v5085_v19  ;;  %v196_v28 = vmul.f32 %v5100_v24, %v5085_v19  ;;  %v74_v18 = vadd.s32 120, %v5043_v3  ;;  %s4962_s26 = scalar_lea.vmem %s2993_s25, 128  ;;  %p4967_p2 = scmp.lt.s32.totalorder %s2993_s25, %s2993_s25 }
  0x31   :  { %vm80_vm5 = vcmp.eq.s32.totalorder %v61_v9, %v5055_v8  ;;  %v247_v30 = vmul.f32 %v5097_v23, %v5111_v29  ;;  %v248_v31 = vmul.f32 %v5100_v24, %v5111_v29  ;;  %vm81_vm6 = vcmp.eq.s32.totalorder %v62_v10, %v5055_v8  ;;  %p4963_p1 = scmp.ne.s32.totalorder %s2993_s25, %s4962_s26  ;;  %p4968_p3 = scmp.lt.s32.totalorder %s4962_s26, %s4962_s26 }
  0x32   :  { %v5120_v32 = vsel %vm80_vm5, 1.0, %v6639_v5  ;;  %v211_v33 = vadd.f32 %v195_v27, %v177_v21  ;;  %v212_v34 = vadd.f32 %v196_v28, %v178_v22  ;;  %v5123_v35 = vsel %vm81_vm6, 1.0, %v6639_v5 }
  0x33   :  { %6798 = vst [vmem:[#allocation17_spill] sm:$0xff] %v5120_v32  ;;  %6799 = vst [vmem:[#allocation18_spill] sm:$0xff] %v5123_v35  ;;  %vm129_vm7 = vcmp.eq.s32.totalorder %v61_v9, %v5075_v15  ;;  %v263_v36 = vadd.f32 %v247_v30, %v229_v25  ;;  %v264_v37 = vadd.f32 %v248_v31, %v230_v26  ;;  %p4969_p4 = por %p4968_p3, %p4967_p2 }
  0x34   :  { %vm130_vm8 = vcmp.eq.s32.totalorder %v62_v10, %v5075_v15  ;;  %v5128_v38 = vsel %vm129_vm7, 1.0, %v6639_v5  ;;  %v387_v39 = vand.u32 4294901760, %v211_v33  ;;  %v390_v40 = vand.u32 4294901760, %v212_v34 }
  0x35   :  { %6800 = vst [vmem:[#allocation19_spill] sm:$0xff] %v5128_v38  ;;  %v5131_v41 = vsel %vm130_vm8, 1.0, %v6639_v5  ;;  %v179_v42 = vmul.f32 %v5120_v32, %v5077_v16  ;;  %v1034_v43 = vand.u32 4294901760, %v263_v36  ;;  %v1037_v44 = vand.u32 4294901760, %v264_v37  ;;  %p4970_p5 = pnand %p4969_p4, %p4963_p1 }
  0x36   :  { %6801 = vst [vmem:[#allocation20_spill] sm:$0xff] %v5131_v41  ;;  %v180_v45 = vmul.f32 %v5123_v35, %v5077_v16  ;;  %v197_v46 = vmul.f32 %v5128_v38, %v5085_v19  ;;  %v5139_v47 = vpack.c.bf16 %v390_v40, %v387_v39  ;;  %v5141_v48 = vsub.f32 %v211_v33, %v387_v39 }
  0x37   :  { %v5143_v49 = vsub.f32 %v212_v34, %v390_v40  ;;  %v198_v50 = vmul.f32 %v5131_v41, %v5085_v19  ;;  %v5147_v51 = vpack.c.bf16 %v1037_v44, %v1034_v43  ;;  %v5149_v52 = vsub.f32 %v263_v36, %v1034_v43 }
  0x38   :  { %v5151_v53 = vsub.f32 %v264_v37, %v1037_v44  ;;  %v213_v54 = vadd.f32 %v197_v46, %v179_v42  ;;  %4297 = vmatpush3.bf16.msra.mxu0 %v5139_v47  ;;  %v231_v56 = vmul.f32 %v5120_v32, %v5087_v20  ;;  %v232_v57 = vmul.f32 %v5123_v35, %v5087_v20 }
  0x39   :  { %v214_v55 = vadd.f32 %v198_v50, %v180_v45  ;;  %v249_v58 = vmul.f32 %v5128_v38, %v5111_v29  ;;  %4441 = vmatpush3.bf16.msra.mxu1 %v5147_v51  ;;  %4298 = vmatprep.subr.bf16.mxu0 %v6655_v1  ;;  %v250_v60 = vmul.f32 %v5131_v41, %v5111_v29 }
  0x3a   :  { %v393_v59 = vand.u32 4294901760, %v213_v54  ;;  %vm82_vm9 = vcmp.eq.s32.totalorder %v5060_v11, %v5055_v8  ;;  %vm83_vm10 = vcmp.eq.s32.totalorder %v5063_v12, %v5055_v8  ;;  %4442 = vmatprep.subr.bf16.mxu1 %v6655_v1  ;;  %vm131_vm11 = vcmp.eq.s32.totalorder %v5060_v11, %v5075_v15 }
  0x3b   :  { %v396_v61 = vand.u32 4294901760, %v214_v55  ;;  %v265_v62 = vadd.f32 %v249_v58, %v231_v56  ;;  %v5170_v63 = vsel %vm82_vm9, 1.0, %v6639_v5  ;;  %v5173_v0 = vsel %vm83_vm10, 1.0, %v6639_v5 }
  0x3c   :  { %6802 = vst [vmem:[#allocation21_spill] sm:$0xff] %v5170_v63  ;;  %6803 = vst [vmem:[#allocation22_spill] sm:$0xff] %v5173_v0  ;;  %v5175_v4 = vsub.f32 %v213_v54, %v393_v59  ;;  %v266_v7 = vadd.f32 %v250_v60, %v232_v57  ;;  %vm132_vm12 = vcmp.eq.s32.totalorder %v5063_v12, %v5075_v15  ;;  %v5186_v22 = vsel %vm131_vm11, 1.0, %v6639_v5 }
  0x3d   :  { %v5181_v9 = vpack.c.bf16 %v396_v61, %v393_v59  ;;  %v5183_v10 = vsub.f32 %v214_v55, %v396_v61  ;;  %v1040_v21 = vand.u32 4294901760, %v265_v62  ;;  %6804 = vst [vmem:[#allocation23_spill] sm:$0xff] %v5186_v22  ;;  %v5189_v26 = vsel %vm132_vm12, 1.0, %v6639_v5 }
  0x3e   :  { %v1043_v25 = vand.u32 4294901760, %v266_v7  ;;  %6805 = vst [vmem:[#allocation24_spill] sm:$0xff] %v5189_v26  ;;  %v181_v27 = vmul.f32 %v5170_v63, %v5077_v16  ;;  %v182_v11 = vmul.f32 %v5173_v0, %v5077_v16  ;;  %v199_v28 = vmul.f32 %v5186_v22, %v5085_v19 }
  0x3f   :  { %4300 = vmatpush3.bf16.msra.mxu0 %v5181_v9  ;;  %v5196_v12 = vsub.f32 %v265_v62, %v1040_v21  ;;  %v200_v30 = vmul.f32 %v5189_v26, %v5085_v19  ;;  %v233_v31 = vmul.f32 %v5170_v63, %v5087_v20  ;;  %v234_v36 = vmul.f32 %v5173_v0, %v5087_v20 }
  0x40   :  { %v5204_v33 = vpack.c.bf16 %v1043_v25, %v1040_v21  ;;  %v5206_v34 = vsub.f32 %v266_v7, %v1043_v25  ;;  %4301 = vmatprep.subr.bf16.mxu0 %v6655_v1  ;;  %v251_v37 = vmul.f32 %v5186_v22, %v5111_v29  ;;  %v215_v39 = vadd.f32 %v199_v28, %v181_v27 }
  0x41   :  { %v216_v40 = vadd.f32 %v200_v30, %v182_v11  ;;  %v252_v42 = vmul.f32 %v5189_v26, %v5111_v29  ;;  %vm84_vm13 = vcmp.eq.s32.totalorder %v5066_v13, %v5055_v8  ;;  %vm85_vm14 = vcmp.eq.s32.totalorder %v5069_v14, %v5055_v8 }
  0x42   :  { %4444 = vmatpush3.bf16.msra.mxu1 %v5204_v33  ;;  %v267_v43 = vadd.f32 %v251_v37, %v233_v31  ;;  %v5221_v44 = vsel %vm84_vm13, 1.0, %v6639_v5  ;;  %vm133_vm15 = vcmp.eq.s32.totalorder %v5066_v13, %v5075_v15  ;;  %v399_v45 = vand.u32 4294901760, %v215_v39 }
  0x43   :  { %6806 = vst [vmem:[#allocation25_spill] sm:$0xff] %v5221_v44  ;;  %4445 = vmatprep.subr.bf16.mxu1 %v6655_v1  ;;  %v402_v46 = vand.u32 4294901760, %v216_v40  ;;  %v268_v50 = vadd.f32 %v252_v42, %v234_v36  ;;  %v5227_v54 = vsel %vm85_vm14, 1.0, %v6639_v5  ;;  %vm134_vm1 = vcmp.eq.s32.totalorder %v5069_v14, %v5075_v15 }
  0x44   :  { %6807 = vst [vmem:[#allocation26_spill] sm:$0xff] %v5227_v54  ;;  %v1046_v55 = vand.u32 4294901760, %v267_v43  ;;  %v5232_v56 = vsel %vm133_vm15, 1.0, %v6639_v5  ;;  %v183_v57 = vmul.f32 %v5221_v44, %v5077_v16  ;;  %v5238_v13 = vsub.f32 %v215_v39, %v399_v45 }
  0x45   :  { %6808 = vst [vmem:[#allocation27_spill] sm:$0xff] %v5232_v56  ;;  %v5236_v58 = vpack.c.bf16 %v402_v46, %v399_v45  ;;  %v5240_v59 = vsub.f32 %v216_v40, %v402_v46  ;;  %v1049_v60 = vand.u32 4294901760, %v268_v50  ;;  %v5245_v62 = vsel %vm134_vm1, 1.0, %v6639_v5 }
  0x46   :  { %v5242_v61 = vsub.f32 %v267_v43, %v1046_v55  ;;  %6810 = vst [vmem:[#allocation29_spill] sm:$0xff] %v5245_v62  ;;  %v184_v14 = vmul.f32 %v5227_v54, %v5077_v16  ;;  %v201_v7 = vmul.f32 %v5232_v56, %v5085_v19  ;;  %v202_v27 = vmul.f32 %v5245_v62, %v5085_v19 }
  0x47   :  { %6809 = vst [vmem:[#allocation28_spill] sm:$0xff] %v5236_v58  ;;  %4303 = vmatpush3.bf16.msra.mxu0 %v5236_v58  ;;  %v5252_v21 = vpack.c.bf16 %v1049_v60, %v1046_v55  ;;  %v5254_v25 = vsub.f32 %v268_v50, %v1049_v60  ;;  %v235_v11 = vmul.f32 %v5221_v44, %v5087_v20  ;;  %v67_v39 = vadd.s32 64, %v5043_v3 }
  0x48   :  { %4304 = vmatprep.subr.bf16.mxu0 %v6655_v1  ;;  %v217_v28 = vadd.f32 %v201_v7, %v183_v57  ;;  %v236_v30 = vmul.f32 %v5227_v54, %v5087_v20  ;;  %v253_v31 = vmul.f32 %v5232_v56, %v5111_v29  ;;  %v254_v36 = vmul.f32 %v5245_v62, %v5111_v29 }
  0x49   :  { %6811 = vst [vmem:[#allocation30_spill] sm:$0xff] %v5252_v21  ;;  %4447 = vmatpush3.bf16.msra.mxu1 %v5252_v21  ;;  %v218_v37 = vadd.f32 %v202_v27, %v184_v14  ;;  %v68_v40 = vadd.s32 72, %v5043_v3  ;;  %v69_v42 = vadd.s32 80, %v5043_v3  ;;  %v70_v50 = vadd.s32 88, %v5043_v3 }
  0x4a   :  { %4448 = vmatprep.subr.bf16.mxu1 %v6655_v1  ;;  %v405_v43 = vand.u32 4294901760, %v217_v28  ;;  %v269_v45 = vadd.f32 %v253_v31, %v235_v11  ;;  %v270_v46 = vadd.f32 %v254_v36, %v236_v30  ;;  %vm86_vm2 = vcmp.eq.s32.totalorder %v67_v39, %v5055_v8 }
  0x4b   :  { %v408_v55 = vand.u32 4294901760, %v218_v37  ;;  %vm87_vm3 = vcmp.eq.s32.totalorder %v68_v40, %v5055_v8  ;;  %vm135_vm4 = vcmp.eq.s32.totalorder %v67_v39, %v5075_v15  ;;  %v5279_v7 = vsel %vm86_vm2, 1.0, %v6639_v5 }
  0x4c   :  { %v5276_v57 = vsub.f32 %v217_v28, %v405_v43  ;;  %v1052_v60 = vand.u32 4294901760, %v269_v45  ;;  %v1055_v14 = vand.u32 4294901760, %v270_v46  ;;  %6812 = vst [vmem:[#allocation31_spill] sm:$0xff] %v5279_v7  ;;  %v5286_v30 = vsel %vm87_vm3, 1.0, %v6639_v5 }
  0x4d   :  { %v5281_v27 = vpack.c.bf16 %v408_v55, %v405_v43  ;;  %v5283_v11 = vsub.f32 %v218_v37, %v408_v55  ;;  %6814 = vst [vmem:[#allocation33_spill] sm:$0xff] %v5286_v30  ;;  %vm136_vm5 = vcmp.eq.s32.totalorder %v68_v40, %v5075_v15  ;;  %v5296_v39 = vsel %vm135_vm4, 1.0, %v6639_v5 }
  0x4e   :  { %v5289_v31 = vpack.c.bf16 %v1055_v14, %v1052_v60  ;;  %v5291_v36 = vsub.f32 %v269_v45, %v1052_v60  ;;  %v5293_v28 = vsub.f32 %v270_v46, %v1055_v14  ;;  %6816 = vst [vmem:[#allocation35_spill] sm:$0xff] %v5296_v39  ;;  %v5300_v43 = vsel %vm136_vm5, 1.0, %v6639_v5 }
  0x4f   :  { %6813 = vst [vmem:[#allocation32_spill] sm:$0xff] %v5281_v27  ;;  %4306 = vmatpush3.bf16.msra.mxu0 %v5281_v27  ;;  %6817 = vst [vmem:[#allocation36_spill] sm:$0xff] %v5300_v43  ;;  %v185_v37 = vmul.f32 %v5279_v7, %v5077_v16  ;;  %v186_v40 = vmul.f32 %v5286_v30, %v5077_v16  ;;  %v203_v45 = vmul.f32 %v5296_v39, %v5085_v19 }
  0x50   :  { %6815 = vst [vmem:[#allocation34_spill] sm:$0xff] %v5289_v31  ;;  %4450 = vmatpush3.bf16.msra.mxu1 %v5289_v31  ;;  %4307 = vmatprep.subr.bf16.mxu0 %v6655_v1  ;;  %v204_v46 = vmul.f32 %v5300_v43, %v5085_v19  ;;  %v237_v55 = vmul.f32 %v5279_v7, %v5087_v20  ;;  %v71_v14 = vadd.s32 96, %v5043_v3  ;;  %v6818_v7 = vmov 0.0  }
  0x51   :  { %v238_v60 = vmul.f32 %v5286_v30, %v5087_v20  ;;  %4451 = vmatprep.subr.bf16.mxu1 %v6655_v1  ;;  %v219_v5 = vadd.f32 %v203_v45, %v185_v37  ;;  %v255_v62 = vmul.f32 %v5296_v39, %v5111_v29  ;;  %v256_v56 = vmul.f32 %v5300_v43, %v5111_v29 }
  0x52   :  { %vm88_vm6 = vcmp.eq.s32.totalorder %v69_v42, %v5055_v8  ;;  %v220_v54 = vadd.f32 %v204_v46, %v186_v40  ;;  %vm89_vm7 = vcmp.eq.s32.totalorder %v70_v50, %v5055_v8  ;;  %vm137_vm8 = vcmp.eq.s32.totalorder %v69_v42, %v5075_v15 }
  0x53   :  { %v5325_v44 = vsel %vm88_vm6, 1.0, %v6818_v7  ;;  %v411_v30 = vand.u32 4294901760, %v219_v5  ;;  %v271_v26 = vadd.f32 %v255_v62, %v237_v55  ;;  %v272_v1 = vadd.f32 %v256_v56, %v238_v60 }
  0x54   :  { %6819 = vst [vmem:[#allocation37_spill] sm:$0xff] %v5325_v44  ;;  %v5329_v37 = vsel %vm89_vm7, 1.0, %v6818_v7  ;;  %v414_v45 = vand.u32 4294901760, %v220_v54  ;;  %vm138_vm9 = vcmp.eq.s32.totalorder %v70_v50, %v5075_v15  ;;  %v5333_v43 = vsel %vm137_vm8, 1.0, %v6818_v7 }
  0x55   :  { %6820 = vst [vmem:[#allocation38_spill] sm:$0xff] %v5329_v37  ;;  %6821 = vst [vmem:[#allocation39_spill] sm:$0xff] %v5333_v43  ;;  %v187_v40 = vmul.f32 %v5325_v44, %v5077_v16  ;;  %v5337_v46 = vsub.f32 %v219_v5, %v411_v30  ;;  %v1058_v39 = vand.u32 4294901760, %v271_v26  ;;  %v1061_v22 = vand.u32 4294901760, %v272_v1 }
  0x56   :  { %v5340_v42 = vsel %vm138_vm9, 1.0, %v6818_v7  ;;  %v5342_v56 = vpack.c.bf16 %v414_v45, %v411_v30  ;;  %v5344_v62 = vsub.f32 %v220_v54, %v414_v45  ;;  %v188_v50 = vmul.f32 %v5329_v37, %v5077_v16 }
  0x57   :  { %6822 = vst [vmem:[#allocation40_spill] sm:$0xff] %v5340_v42  ;;  %v205_v55 = vmul.f32 %v5333_v43, %v5085_v19  ;;  %v5350_v60 = vpack.c.bf16 %v1061_v22, %v1058_v39  ;;  %v5352_v0 = vsub.f32 %v271_v26, %v1058_v39  ;;  %v5354_v5 = vsub.f32 %v272_v1, %v1061_v22 }
  0x58   :  { %6823 = vst [vmem:[#allocation41_spill] sm:$0xff] %v5342_v56  ;;  %v206_v63 = vmul.f32 %v5340_v42, %v5085_v19  ;;  %4309 = vmatpush3.bf16.msra.mxu0 %v5342_v56  ;;  %v239_v54 = vmul.f32 %v5325_v44, %v5087_v20  ;;  %v240_v45 = vmul.f32 %v5329_v37, %v5087_v20  ;;  %v6825_v26 = vmov 0.0|0.0  }
  0x59   :  { %6824 = vst [vmem:[#allocation42_spill] sm:$0xff] %v5350_v60  ;;  %v221_v30 = vadd.f32 %v205_v55, %v187_v40  ;;  %v257_v41 = vmul.f32 %v5333_v43, %v5111_v29  ;;  %4453 = vmatpush3.bf16.msra.mxu1 %v5350_v60  ;;  %4310 = vmatprep.subr.bf16.mxu0 %v6825_v26  ;;  %v72_v39 = vadd.s32 104, %v5043_v3  ;;  %v6736_v60 = vand.u32 4294901760, %v5254_v25 }
  0x5a   :  { %v222_v1 = vadd.f32 %v206_v63, %v188_v50  ;;  %v258_v22 = vmul.f32 %v5340_v42, %v5111_v29  ;;  %vm90_vm10 = vcmp.eq.s32.totalorder %v71_v14, %v5055_v8  ;;  %4454 = vmatprep.subr.bf16.mxu1 %v6825_v26  ;;  %vm139_vm11 = vcmp.eq.s32.totalorder %v71_v14, %v5075_v15 }
  0x5b   :  { %v417_v40 = vand.u32 4294901760, %v221_v30  ;;  %v273_v55 = vadd.f32 %v257_v41, %v239_v54  ;;  %v5373_v37 = vsel %vm90_vm10, 1.0, %v6818_v7  ;;  %vm91_vm12 = vcmp.eq.s32.totalorder %v72_v39, %v5055_v8 }
  0x5c   :  { %6826 = vst [vmem:[#allocation43_spill] sm:$0xff] %v5373_v37  ;;  %v420_v43 = vand.u32 4294901760, %v222_v1  ;;  %v274_v44 = vadd.f32 %v258_v22, %v240_v45  ;;  %vm140_vm13 = vcmp.eq.s32.totalorder %v72_v39, %v5075_v15  ;;  %v5381_v42 = vsel %vm91_vm12, 1.0, %v6818_v7 }
  0x5d   :  { %v5378_v63 = vsub.f32 %v221_v30, %v417_v40  ;;  %v1064_v50 = vand.u32 4294901760, %v273_v55  ;;  %6827 = vst [vmem:[#allocation44_spill] sm:$0xff] %v5381_v42  ;;  %v5384_v35 = vsel %vm139_vm11, 1.0, %v6818_v7  ;;  %v5391_v45 = vsel %vm140_vm13, 1.0, %v6818_v7 }
  0x5e   :  { %6828 = vst [vmem:[#allocation45_spill] sm:$0xff] %v5384_v35  ;;  %v5386_v41 = vpack.c.bf16 %v420_v43, %v417_v40  ;;  %v5388_v54 = vsub.f32 %v222_v1, %v420_v43  ;;  %v1067_v14 = vand.u32 4294901760, %v274_v44  ;;  %6830 = vst [vmem:[#allocation47_spill] sm:$0xff] %v5391_v45  ;;  %v189_v30 = vmul.f32 %v5373_v37, %v5077_v16 }
  0x5f   :  { %v5393_v22 = vsub.f32 %v273_v55, %v1064_v50  ;;  %v190_v39 = vmul.f32 %v5381_v42, %v5077_v16  ;;  %v207_v38 = vmul.f32 %v5384_v35, %v5085_v19  ;;  %v208_v1 = vmul.f32 %v5391_v45, %v5085_v19 }
  0x60   :  { %6829 = vst [vmem:[#allocation46_spill] sm:$0xff] %v5386_v41  ;;  %4312 = vmatpush3.bf16.msra.mxu0 %v5386_v41  ;;  %v5402_v40 = vpack.c.bf16 %v1067_v14, %v1064_v50  ;;  %v5404_v43 = vsub.f32 %v274_v44, %v1067_v14  ;;  %v241_v55 = vmul.f32 %v5373_v37, %v5087_v20  ;;  %v73_v14 = vadd.s32 112, %v5043_v3 }
  0x61   :  { %4313 = vmatprep.subr.bf16.mxu0 %v6825_v26  ;;  %v223_v32 = vadd.f32 %v207_v38, %v189_v30  ;;  %v242_v24 = vmul.f32 %v5381_v42, %v5087_v20  ;;  %v259_v23 = vmul.f32 %v5384_v35, %v5111_v29  ;;  %v260_v50 = vmul.f32 %v5391_v45, %v5111_v29 }
  0x62   :  { %6831 = vst [vmem:[#allocation48_spill] sm:$0xff] %v5402_v40  ;;  %4456 = vmatpush3.bf16.msra.mxu1 %v5402_v40  ;;  %v224_v44 = vadd.f32 %v208_v1, %v190_v39  ;;  %v5422_v37 = vsub.f32 %v5041_v2, %v5052_v6  ;;  %v6713_v35 = vand.u32 4294901760, %v5141_v48  ;;  %vm92_vm14 = vcmp.eq.s32.totalorder %v73_v14, %v5055_v8 }
  0x63   :  { %4457 = vmatprep.subr.bf16.mxu1 %v6825_v26  ;;  %v423_v38 = vand.u32 4294901760, %v223_v32  ;;  %v275_v30 = vadd.f32 %v259_v23, %v241_v55  ;;  %v276_v42 = vadd.f32 %v260_v50, %v242_v24  ;;  %vm93_vm15 = vcmp.eq.s32.totalorder %v74_v18, %v5055_v8 }
  0x64   :  { %v426_v17 = vand.u32 4294901760, %v224_v44  ;;  %vm141_vm1 = vcmp.eq.s32.totalorder %v73_v14, %v5075_v15  ;;  %v5432_v2 = vsel %vm92_vm14, 1.0, %v6818_v7  ;;  %v5439_v24 = vsel %vm93_vm15, 1.0, %v6818_v7 }
  0x65   :  { %v5429_v39 = vsub.f32 %v223_v32, %v423_v38  ;;  %v1070_v3 = vand.u32 4294901760, %v275_v30  ;;  %v1073_v1 = vand.u32 4294901760, %v276_v42  ;;  %6832 = vst [vmem:[#allocation49_spill] sm:$0xff] %v5432_v2  ;;  %6834 = vst [vmem:[#allocation51_spill] sm:$0xff] %v5439_v24  ;;  %vm142_vm2 = vcmp.eq.s32.totalorder %v74_v18, %v5075_v15 }
  0x66   :  { %v5434_v45 = vpack.c.bf16 %v426_v17, %v423_v38  ;;  %v5436_v23 = vsub.f32 %v224_v44, %v426_v17  ;;  %v5449_v50 = vsel %vm141_vm1, 1.0, %v6818_v7  ;;  %v5453_v14 = vsel %vm142_vm2, 1.0, %v6818_v7 }
  0x67   :  { %v5442_v55 = vpack.c.bf16 %v1073_v1, %v1070_v3  ;;  %v5444_v8 = vsub.f32 %v275_v30, %v1070_v3  ;;  %v5446_v32 = vsub.f32 %v276_v42, %v1073_v1  ;;  %6836 = vst [vmem:[#allocation53_spill] sm:$0xff] %v5449_v50  ;;  %6837 = vst [vmem:[#allocation54_spill] sm:$0xff] %v5453_v14  ;;  %v5470_v30 = vand.u32 4294901760, %v5422_v37 }
  0x68   :  { %6833 = vst [vmem:[#allocation50_spill] sm:$0xff] %v5434_v45  ;;  %4315 = vmatpush3.bf16.msra.mxu0 %v5434_v45  ;;  %v191_v17 = vmul.f32 %v5432_v2, %v5077_v16  ;;  %v192_v15 = vmul.f32 %v5439_v24, %v5077_v16  ;;  %v209_v18 = vmul.f32 %v5449_v50, %v5085_v19 }
  0x69   :  { %6835 = vst [vmem:[#allocation52_spill] sm:$0xff] %v5442_v55  ;;  %4459 = vmatpush3.bf16.msra.mxu1 %v5442_v55  ;;  %4316 = vmatprep.subr.bf16.mxu0 %v6825_v26  ;;  %v210_v42 = vmul.f32 %v5453_v14, %v5085_v19  ;;  %v243_v44 = vmul.f32 %v5432_v2, %v5087_v20  ;;  %6838 = vst [vmem:[#allocation55_spill] sm:$0xff] %v5470_v30  ;;  %v6719_v55 = vand.u32 4294901760, %v5149_v52 }
  0x6a   :  { %v244_v38 = vmul.f32 %v5439_v24, %v5087_v20  ;;  %4460 = vmatprep.subr.bf16.mxu1 %v6825_v26  ;;  %v225_v16 = vadd.f32 %v209_v18, %v191_v17  ;;  %v261_v3 = vmul.f32 %v5449_v50, %v5111_v29  ;;  %v262_v1 = vmul.f32 %v5453_v14, %v5111_v29 }
  0x6b   :  { %v481_v19 = vsub.f32 %v5141_v48, %v6713_v35  ;;  %v226_v2 = vadd.f32 %v210_v42, %v192_v15  ;;  %v470_v20 = vsub.f32 %v5422_v37, %v5470_v30  ;;  %v6718_v24 = vand.u32 4294901760, %v5143_v49 }
  0x6c   :  { %v429_v45 = vand.u32 4294901760, %v225_v16  ;;  %v277_v17 = vadd.f32 %v261_v3, %v243_v44  ;;  %v278_v18 = vadd.f32 %v262_v1, %v244_v38  ;;  %v1128_v15 = vsub.f32 %v5149_v52, %v6719_v55 }
  0x6d   :  { %v482_v40 = vand.u32 4294901760, %v481_v19  ;;  %v432_v50 = vand.u32 4294901760, %v226_v2  ;;  %v5484_v41 = vand.u32 4294901760, %v470_v20  ;;  %v488_v29 = vsub.f32 %v5143_v49, %v6718_v24 }
  0x6e   :  { %v5492_v42 = vsub.f32 %v225_v16, %v429_v45  ;;  %v1076_v35 = vand.u32 4294901760, %v277_v17  ;;  %v1079_v14 = vand.u32 4294901760, %v278_v18  ;;  %v6720_v30 = vand.u32 4294901760, %v5151_v53 }
  0x6f   :  { %6839 = vst [vmem:[#allocation56_spill] sm:$0xff] %v5484_v41  ;;  %v5495_v44 = vpack.c.bf16 %v432_v50, %v429_v45  ;;  %v5497_v38 = vsub.f32 %v226_v2, %v432_v50  ;;  %v489_v3 = vand.u32 4294901760, %v488_v29  ;;  %v1129_v1 = vand.u32 4294901760, %v1128_v15 }
  0x70   :  { %v5499_v19 = vpack.c.bf16 %v1079_v14, %v1076_v35  ;;  %v5501_v20 = vsub.f32 %v277_v17, %v1076_v35  ;;  %v5503_v24 = vsub.f32 %v278_v18, %v1079_v14  ;;  %v1135_v16 = vsub.f32 %v5151_v53, %v6720_v30 }
  0x71   :  { %6840 = vst [vmem:[#allocation57_spill] sm:$0xff] %v5495_v44  ;;  %4318 = vmatpush3.bf16.msra.mxu0 %v5495_v44  ;;  %v4320_v55 = vpack.c.bf16 %v489_v3, %v482_v40  ;;  %v6721_v45 = vand.u32 4294901760, %v5175_v4  ;;  %v6722_v2 = vand.u32 4294901760, %v5183_v10  ;;  %v6723_v50 = vand.u32 4294901760, %v5196_v12 }
  0x72   :  { %6841 = vst [vmem:[#allocation58_spill] sm:$0xff] %v5499_v19  ;;  %4462 = vmatpush3.bf16.msra.mxu1 %v5499_v19  ;;  %4319 = vmatprep.subr.bf16.mxu0 %v6825_v26  ;;  %v1136_v35 = vand.u32 4294901760, %v1135_v16  ;;  %v6726_v14 = vand.u32 4294901760, %v5206_v34  ;;  %v6729_v17 = vand.u32 4294901760, %v5238_v13  ;;  %v6732_v18 = vand.u32 4294901760, %v5240_v59 }
  0x73   :  { %4463 = vmatprep.subr.bf16.mxu1 %v6825_v26  ;;  %v495_v40 = vsub.f32 %v5175_v4, %v6721_v45  ;;  %v502_v29 = vsub.f32 %v5183_v10, %v6722_v2  ;;  %v1142_v15 = vsub.f32 %v5196_v12, %v6723_v50  ;;  %v578_v31 = vand.u32 4294901760, %v5492_v42 }
  0x74   :  { %3488 = vmatmul.mubr.f32.vlgmr.msra.gmra.mrb[0].mxu0 %v5484_v41  ;;  %v4464_v16 = vpack.c.bf16 %v1136_v35, %v1129_v1  ;;  %v1149_v30 = vsub.f32 %v5206_v34, %v6726_v14  ;;  %v509_v45 = vsub.f32 %v5238_v13, %v6729_v17  ;;  %v516_v2 = vsub.f32 %v5240_v59, %v6732_v18 }
  0x75   :  { %4321 = vmatpush3.bf16.msra.mxu0 %v4320_v55  ;;  %3698 = vmatmul.mubr.f32.vlgmr.msra.gmra.mrb[0].mxu1 %v5484_v41  ;;  %v496_v50 = vand.u32 4294901760, %v495_v40  ;;  %v503_v3 = vand.u32 4294901760, %v502_v29  ;;  %v1143_v19 = vand.u32 4294901760, %v1142_v15  ;;  %v6842_v1 = vand.u32 4294901760, %v5242_v61 }
  0x76   :  { %4465 = vmatpush3.bf16.msra.mxu1 %v4464_v16  ;;  %4322 = vmatprep.subr.bf16.mxu0 %v6825_v26  ;;  %v1150_v14 = vand.u32 4294901760, %v1149_v30  ;;  %v510_v44 = vand.u32 4294901760, %v509_v45  ;;  %v517_v17 = vand.u32 4294901760, %v516_v2  ;;  %v6734_v40 = vand.u32 4294901760, %v5276_v57 }
  0x77   :  { %v1156_v35 = vsub.f32 %v5242_v61, %v6842_v1  ;;  %4466 = vmatprep.subr.bf16.mxu1 %v6825_v26  ;;  %v4323_v55 = vpack.c.bf16 %v503_v3, %v496_v50  ;;  %v6733_v29 = vand.u32 4294901760, %v5283_v11  ;;  %3522 = vmatprep.mubr.msk.f32.mxu0 %vm4994_vm0, %v6818_v7  ;;  %v1163_v30 = vsub.f32 %v5254_v25, %v6736_v60 }
  0x78   :  { %v4467_v15 = vpack.c.bf16 %v1150_v14, %v1143_v19  ;;  %v4326_v16 = vpack.c.bf16 %v517_v17, %v510_v44  ;;  %v6735_v45 = vand.u32 4294901760, %v5291_v36  ;;  %3732 = vmatprep.mubr.msk.f32.mxu1 %vm4994_vm0, %v6818_v7  ;;  %v523_v2 = vsub.f32 %v5276_v57, %v6734_v40 }
  0x79   :  { %v1157_v18 = vand.u32 4294901760, %v1156_v35  ;;  %4324 = vmatpush3.bf16.msra.mxu0 %v4323_v55  ;;  %v530_v50 = vsub.f32 %v5283_v11, %v6733_v29  ;;  %v6739_v44 = vand.u32 4294901760, %v5293_v28  ;;  %v6740_v19 = vand.u32 4294901760, %v5337_v46 }
  0x7a   :  { %4468 = vmatpush3.bf16.msra.mxu1 %v4467_v15  ;;  %4325 = vmatprep.subr.bf16.mxu0 %v6825_v26  ;;  %v1164_v14 = vand.u32 4294901760, %v1163_v30  ;;  %v1170_v17 = vsub.f32 %v5291_v36, %v6735_v45  ;;  %v6741_v3 = vand.u32 4294901760, %v5344_v62  ;;  %v6747_v1 = vand.u32 4294901760, %v5352_v0 }
  0x7b   :  { %4469 = vmatprep.subr.bf16.mxu1 %v6825_v26  ;;  %v524_v35 = vand.u32 4294901760, %v523_v2  ;;  %v531_v55 = vand.u32 4294901760, %v530_v50  ;;  %v1177_v29 = vsub.f32 %v5293_v28, %v6739_v44  ;;  %v537_v15 = vsub.f32 %v5337_v46, %v6740_v19 }
  0x7c   :  { %v4470_v30 = vpack.c.bf16 %v1164_v14, %v1157_v18  ;;  %v1171_v40 = vand.u32 4294901760, %v1170_v17  ;;  %v544_v45 = vsub.f32 %v5344_v62, %v6741_v3  ;;  %v1184_v60 = vsub.f32 %v5352_v0, %v6747_v1 }
  0x7d   :  { %4327 = vmatpush3.bf16.msra.mxu0 %v4326_v16  ;;  %v4329_v2 = vpack.c.bf16 %v531_v55, %v524_v35  ;;  %v1178_v50 = vand.u32 4294901760, %v1177_v29  ;;  %v538_v41 = vand.u32 4294901760, %v537_v15  ;;  %v6745_v44 = vand.u32 4294901760, %v5354_v5 }
  0x7e   :  { %4471 = vmatpush3.bf16.msra.mxu1 %v4470_v30  ;;  %4328 = vmatprep.subr.bf16.mxu0 %v6825_v26  ;;  %v545_v19 = vand.u32 4294901760, %v544_v45  ;;  %v1185_v18 = vand.u32 4294901760, %v1184_v60  ;;  %v6742_v14 = vand.u32 4294901760, %v5378_v63  ;;  %v6744_v17 = vand.u32 4294901760, %v5388_v54 }
  0x7f   :  { %4472 = vmatprep.subr.bf16.mxu1 %v6825_v26  ;;  %v4473_v3 = vpack.c.bf16 %v1178_v50, %v1171_v40  ;;  %v1191_v16 = vsub.f32 %v5354_v5, %v6745_v44  ;;  %v6743_v29 = vand.u32 4294901760, %v5393_v22  ;;  %v6746_v35 = vand.u32 4294901760, %v5404_v43 }
  0x80   :  { %v4332_v55 = vpack.c.bf16 %v545_v19, %v538_v41  ;;  %v551_v60 = vsub.f32 %v5378_v63, %v6742_v14  ;;  %v558_v45 = vsub.f32 %v5388_v54, %v6744_v17  ;;  %v6750_v15 = vand.u32 4294901760, %v5429_v39 }
  0x81   :  { %4330 = vmatpush3.bf16.msra.mxu0 %v4329_v2  ;;  %v1192_v40 = vand.u32 4294901760, %v1191_v16  ;;  %v1198_v30 = vsub.f32 %v5393_v22, %v6743_v29  ;;  %v1205_v41 = vsub.f32 %v5404_v43, %v6746_v35  ;;  %v6755_v19 = vand.u32 4294901760, %v5436_v23 }
  0x82   :  { %4474 = vmatpush3.bf16.msra.mxu1 %v4473_v3  ;;  %4331 = vmatprep.subr.bf16.mxu0 %v6825_v26  ;;  %v552_v50 = vand.u32 4294901760, %v551_v60  ;;  %v559_v14 = vand.u32 4294901760, %v558_v45  ;;  %v565_v2 = vsub.f32 %v5429_v39, %v6750_v15  ;;  %v1211_v16 = vand.u32 4294901760, %v5444_v8 }
  0x83   :  { %4475 = vmatprep.subr.bf16.mxu1 %v6825_v26  ;;  %v4476_v29 = vpack.c.bf16 %v1192_v40, %v1185_v18  ;;  %v1199_v17 = vand.u32 4294901760, %v1198_v30  ;;  %v1206_v44 = vand.u32 4294901760, %v1205_v41  ;;  %v572_v35 = vsub.f32 %v5436_v23, %v6755_v19 }
  0x84   :  { %v4335_v3 = vpack.c.bf16 %v559_v14, %v552_v50  ;;  %v566_v1 = vand.u32 4294901760, %v565_v2  ;;  %v1212_v60 = vsub.f32 %v5444_v8, %v1211_v16  ;;  %v1218_v45 = vand.u32 4294901760, %v5446_v32 }
  0x85   :  { %4333 = vmatpush3.bf16.msra.mxu0 %v4332_v55  ;;  %v4479_v56 = vpack.c.bf16 %v1206_v44, %v1199_v17  ;;  %v573_v15 = vand.u32 4294901760, %v572_v35  ;;  %v585_v27 = vand.u32 4294901760, %v5497_v38  ;;  %v1225_v14 = vand.u32 4294901760, %v5501_v20 }
  0x86   :  { %4477 = vmatpush3.bf16.msra.mxu1 %v4476_v29  ;;  %4334 = vmatprep.subr.bf16.mxu0 %v6825_v26  ;;  %v1213_v18 = vand.u32 4294901760, %v1212_v60  ;;  %v1219_v40 = vsub.f32 %v5446_v32, %v1218_v45  ;;  %v1232_v30 = vand.u32 4294901760, %v5503_v24  ;;  %v579_v55 = vsub.f32 %v5492_v42, %v578_v31 }
  0x87   :  { %4478 = vmatprep.subr.bf16.mxu1 %v6825_v26  ;;  %v586_v44 = vsub.f32 %v5497_v38, %v585_v27  ;;  %v1226_v35 = vsub.f32 %v5501_v20, %v1225_v14  ;;  %v4338_v41 = vpack.c.bf16 %v573_v15, %v566_v1  ;;  %v6843_v1 = vand.u32 4294901760, %v5141_v48 }
  0x88   :  { %v1220_v17 = vand.u32 4294901760, %v1219_v40  ;;  %v1233_v29 = vsub.f32 %v5503_v24, %v1232_v30  ;;  %v580_v50 = vand.u32 4294901760, %v579_v55  ;;  %v4344_v40 = vpack.c.bf16 %v5143_v49, %v5141_v48 }
  0x89   :  { %4336 = vmatpush3.bf16.msra.mxu0 %v4335_v3  ;;  %v587_v2 = vand.u32 4294901760, %v586_v44  ;;  %v1227_v19 = vand.u32 4294901760, %v1226_v35  ;;  %v6846_v55 = vand.u32 4294901760, %v5151_v53  ;;  %v6848_v35 = vand.u32 4294901760, %v5183_v10 }
  0x8a   :  { %4480 = vmatpush3.bf16.msra.mxu1 %v4479_v56  ;;  %4337 = vmatprep.subr.bf16.mxu0 %v6825_v26  ;;  %v4482_v60 = vpack.c.bf16 %v1220_v17, %v1213_v18  ;;  %v1234_v21 = vand.u32 4294901760, %v1233_v29  ;;  %v6844_v56 = vand.u32 4294901760, %v5143_v49  ;;  %v6845_v18 = vand.u32 4294901760, %v5149_v52 }
  0x8b   :  { %4481 = vmatprep.subr.bf16.mxu1 %v6825_v26  ;;  %v4341_v58 = vpack.c.bf16 %v587_v2, %v580_v50  ;;  %v6847_v17 = vand.u32 4294901760, %v5175_v4  ;;  %v6849_v48 = vand.u32 4294901760, %v5196_v12  ;;  %v6850_v49 = vand.u32 4294901760, %v5206_v34 }
  0x8c   :  { %v4485_v3 = vpack.c.bf16 %v1234_v21, %v1227_v19  ;;  %v5637_v15 = vpack.c.bf16 %v6844_v56, %v6843_v1  ;;  %v5643_v44 = vpack.c.bf16 %v6846_v55, %v6845_v18  ;;  %v6851_v19 = vand.u32 4294901760, %v5238_v13 }
  0x8d   :  { %4339 = vmatpush3.bf16.msra.mxu0 %v4338_v41  ;;  %v5650_v29 = vpack.c.bf16 %v6848_v35, %v6847_v17  ;;  %v5656_v21 = vpack.c.bf16 %v6850_v49, %v6849_v48  ;;  %v6852_v41 = vand.u32 4294901760, %v5240_v59  ;;  %v6853_v2 = vand.u32 4294901760, %v5242_v61 }
  0x8e   :  { %4483 = vmatpush3.bf16.msra.mxu1 %v4482_v60  ;;  %4340 = vmatprep.subr.bf16.mxu0 %v6825_v26  ;;  %v6854_v60 = vand.u32 4294901760, %v5254_v25  ;;  %v6856_v56 = vand.u32 4294901760, %v5276_v57  ;;  %v6857_v18 = vand.u32 4294901760, %v5283_v11  ;;  %v6859_v17 = vand.u32 4294901760, %v5291_v36 }
  0x8f   :  { %4484 = vmatprep.subr.bf16.mxu1 %v6825_v26  ;;  %v5662_v50 = vpack.c.bf16 %v6852_v41, %v6851_v19  ;;  %v6860_v35 = vand.u32 4294901760, %v5293_v28  ;;  %v6862_v49 = vand.u32 4294901760, %v5337_v46  ;;  %v6863_v19 = vand.u32 4294901760, %v5344_v62 }
  0x90   :  { %v5668_v1 = vpack.c.bf16 %v6854_v60, %v6853_v2  ;;  %v5674_v55 = vpack.c.bf16 %v6857_v18, %v6856_v56  ;;  %v6865_v2 = vand.u32 4294901760, %v5352_v0  ;;  %v6866_v60 = vand.u32 4294901760, %v5354_v5 }
  0x91   :  { %v5680_v48 = vpack.c.bf16 %v6860_v35, %v6859_v17  ;;  %v5686_v41 = vpack.c.bf16 %v6863_v19, %v6862_v49  ;;  %4342 = vmatpush3.bf16.msra.mxu0 %v4341_v58  ;;  %v6867_v56 = vand.u32 4294901760, %v5378_v63  ;;  %v6868_v18 = vand.u32 4294901760, %v5388_v54 }
  0x92   :  { %6855 = vst [vmem:[#allocation59_spill] sm:$0xff] %v5668_v1  ;;  %6858 = vst [vmem:[#allocation60_spill] sm:$0xff] %v5674_v55  ;;  %v5692_v1 = vpack.c.bf16 %v6866_v60, %v6865_v2  ;;  %v6869_v17 = vand.u32 4294901760, %v5393_v22  ;;  %v6870_v35 = vand.u32 4294901760, %v5404_v43  ;;  %v6871_v49 = vand.u32 4294901760, %v5429_v39  ;;  %4486 = vmatpush3.bf16.msra.mxu1 %v4485_v3  ;;  %4343 = vmatprep.subr.bf16.mxu0 %v6825_v26  ;;  %v6892_v3 = vld [vmem:[#allocation15_spill] sm:$0xff] }
  0x93   :  { %6861 = vst [vmem:[#allocation61_spill] sm:$0xff] %v5680_v48  ;;  %6864 = vst [vmem:[#allocation62_spill] sm:$0xff] %v5686_v41  ;;  %v5698_v55 = vpack.c.bf16 %v6868_v18, %v6867_v56  ;;  %v6872_v19 = vand.u32 4294901760, %v5436_v23  ;;  %v5712_v2 = vpack.c.bf16 %v1218_v45, %v1211_v16  ;;  %v4488_v58 = vpack.c.bf16 %v5151_v53, %v5149_v52  ;;  %v6890_v45 = vld [vmem:[#allocation13_spill] sm:$0xff]  ;;  %v6895_v18 = vld [vmem:[#allocation19_spill] sm:$0xff] }
  0x94   :  { %v5704_v48 = vpack.c.bf16 %v6870_v35, %v6869_v17  ;;  %v5717_v60 = vpack.c.bf16 %v585_v27, %v578_v31  ;;  %v5719_v56 = vpack.c.bf16 %v1232_v30, %v1225_v14  ;;  %4487 = vmatprep.subr.bf16.mxu1 %v6825_v26  ;;  %3523 = vmatmul.mubr.f32.vlgmr.msra.gmra.mrb[0].mxu0 %v5052_v6  ;;  %v6874_v31 = vld [vmem:[#allocation30_spill] sm:$0xff] }
  0x95   :  { %v5710_v41 = vpack.c.bf16 %v6872_v19, %v6871_v49  ;;  %4345 = vmatpush3.bf16.msra.mxu0 %v4344_v40  ;;  %3733 = vmatmul.mubr.f32.vlgmr.msra.gmra.mrb[0].mxu1 %v5052_v6  ;;  %v4347_v16 = vpack.c.bf16 %v5183_v10, %v5175_v4  ;;  %v4491_v52 = vpack.c.bf16 %v5206_v34, %v5196_v12  ;;  %v6891_v30 = vld [vmem:[#allocation14_spill] sm:$0xff] }
  0x96   :  { %4489 = vmatpush3.bf16.msra.mxu1 %v4488_v58  ;;  %4346 = vmatprep.subr.bf16.mxu0 %v6825_v26  ;;  %v4350_v53 = vpack.c.bf16 %v5240_v59, %v5238_v13  ;;  %v4494_v4 = vpack.c.bf16 %v5254_v25, %v5242_v61  ;;  %v4353_v10 = vpack.c.bf16 %v5283_v11, %v5276_v57  ;;  %v6873_v11 = vld [vmem:[#allocation28_spill] sm:$0xff]  ;;  %v6896_v58 = vld [vmem:[#allocation18_spill] sm:$0xff] }
  0x97   :  { %4490 = vmatprep.subr.bf16.mxu1 %v6825_v26  ;;  %3557 = vmatprep.mubr.msk.f32.mxu0 %vm4994_vm0, %v6818_v7  ;;  %v4497_v12 = vpack.c.bf16 %v5293_v28, %v5291_v36  ;;  %v4356_v34 = vpack.c.bf16 %v5344_v62, %v5337_v46  ;;  %v4500_v13 = vpack.c.bf16 %v5354_v5, %v5352_v0  ;;  %v6875_v36 = vld [vmem:[#allocation32_spill] sm:$0xff]  ;;  %v6876_v28 = vld [vmem:[#allocation34_spill] sm:$0xff]  ;;  %v6877_v46 = vld [vmem:[#allocation41_spill] sm:$0xff] }
  0x98   :  { %3767 = vmatprep.mubr.msk.f32.mxu1 %vm4994_vm0, %v6818_v7  ;;  %v4359_v59 = vpack.c.bf16 %v5388_v54, %v5378_v63  ;;  %v4503_v61 = vpack.c.bf16 %v5404_v43, %v5393_v22  ;;  %v4362_v25 = vpack.c.bf16 %v5436_v23, %v5429_v39  ;;  %v4506_v0 = vpack.c.bf16 %v5446_v32, %v5444_v8  ;;  %v6878_v62 = vld [vmem:[#allocation42_spill] sm:$0xff]  ;;  %v6880_v63 = vld [vmem:[#allocation48_spill] sm:$0xff]  ;;  %v6883_v43 = vld [vmem:[#allocation57_spill] sm:$0xff] }
  0x99   :  { %4348 = vmatpush3.bf16.msra.mxu0 %v4347_v16  ;;  %v4365_v57 = vpack.c.bf16 %v5497_v38, %v5492_v42  ;;  %v4509_v27 = vpack.c.bf16 %v5503_v24, %v5501_v20  ;;  %v6879_v5 = vld [vmem:[#allocation46_spill] sm:$0xff]  ;;  %v6882_v22 = vld [vmem:[#allocation52_spill] sm:$0xff]  ;;  %v6885_v23 = vld [vmem:[#allocation55_spill] sm:$0xff]  ;;  %v5848_v38 = vstv %s3037_s4  ;;  %v5851_v20 = vstv %s3038_s11 }
  0x9a   :  { %4492 = vmatpush3.bf16.msra.mxu1 %v4491_v52  ;;  %4349 = vmatprep.subr.bf16.mxu0 %v6825_v26  ;;  %v6881_v54 = vld [vmem:[#allocation50_spill] sm:$0xff]  ;;  %v6886_v24 = vld [vmem:[#allocation59_spill] sm:$0xff]  ;;  %v6887_v8 = vld [vmem:[#allocation60_spill] sm:$0xff]  ;;  %v281_v14 = vmul.f32 %v6890_v45, %v5848_v38  ;;  %v282_v40 = vmul.f32 %v6891_v30, %v5848_v38  ;;  %v301_v17 = vmul.f32 %v6895_v18, %v5851_v20 }
  0x9b   :  { %4493 = vmatprep.subr.bf16.mxu1 %v6825_v26  ;;  %v6884_v39 = vld [vmem:[#allocation58_spill] sm:$0xff]  ;;  %v6888_v32 = vld [vmem:[#allocation61_spill] sm:$0xff] }
  0x9c   :  { %v6889_v42 = vld [vmem:[#allocation62_spill] sm:$0xff] }
  0x9d   :  { %4351 = vmatpush3.bf16.msra.mxu0 %v4350_v53 }
  0x9e   :  { %4495 = vmatpush3.bf16.msra.mxu1 %v4494_v4  ;;  %4352 = vmatprep.subr.bf16.mxu0 %v6825_v26 }
  0x9f   :  { %4496 = vmatprep.subr.bf16.mxu1 %v6825_v26 }
  0xa1   :  { %4354 = vmatpush3.bf16.msra.mxu0 %v4353_v10 }
  0xa2   :  { %4498 = vmatpush3.bf16.msra.mxu1 %v4497_v12  ;;  %4355 = vmatprep.subr.bf16.mxu0 %v6825_v26 }
  0xa3   :  { %4499 = vmatprep.subr.bf16.mxu1 %v6825_v26 }
  0xa5   :  { %4357 = vmatpush3.bf16.msra.mxu0 %v4356_v34 }
  0xa6   :  { %4501 = vmatpush3.bf16.msra.mxu1 %v4500_v13  ;;  %4358 = vmatprep.subr.bf16.mxu0 %v6825_v26 }
  0xa7   :  { %4502 = vmatprep.subr.bf16.mxu1 %v6825_v26 }
  0xa9   :  { %4360 = vmatpush3.bf16.msra.mxu0 %v4359_v59 }
  0xaa   :  { %4504 = vmatpush3.bf16.msra.mxu1 %v4503_v61  ;;  %4361 = vmatprep.subr.bf16.mxu0 %v6825_v26 }
  0xab   :  { %4505 = vmatprep.subr.bf16.mxu1 %v6825_v26 }
  0xad   :  { %4363 = vmatpush3.bf16.msra.mxu0 %v4362_v25 }
  0xae   :  { %4507 = vmatpush3.bf16.msra.mxu1 %v4506_v0  ;;  %4364 = vmatprep.subr.bf16.mxu0 %v6825_v26  ;;  %v6898_v0 = vld [vmem:[#allocation21_spill] sm:$0xff] }
  0xaf   :  { %4508 = vmatprep.subr.bf16.mxu1 %v6825_v26 }
  0xb1   :  { %4366 = vmatpush3.bf16.msra.mxu0 %v4365_v57  ;;  %v285_v57 = vmul.f32 %v6898_v0, %v5848_v38 }
  0xb2   :  { %4510 = vmatpush3.bf16.msra.mxu1 %v4509_v27  ;;  %4367 = vmatprep.subr.bf16.mxu0 %v6825_v26  ;;  %v6899_v27 = vld [vmem:[#allocation22_spill] sm:$0xff] }
  0xb3   :  { %4511 = vmatprep.subr.bf16.mxu1 %v6825_v26 }
  0xb4   :  { %3558 = vmatmul.mubr.f32.vlgmr.msra.gmra.mrb[0].mxu0 %v5422_v37 }
  0xb5   :  { %4369 = vmatpush3.bf16.msra.mxu0 %v5139_v47  ;;  %3768 = vmatmul.mubr.f32.vlgmr.msra.gmra.mrb[0].mxu1 %v5422_v37 }
  0xb6   :  { %4513 = vmatpush3.bf16.msra.mxu1 %v5147_v51  ;;  %4370 = vmatprep.subr.bf16.mxu0 %v6825_v26 }
  0xb7   :  { %4514 = vmatprep.subr.bf16.mxu1 %v6825_v26  ;;  %3592 = vmatprep.mubr.msk.f32.mxu0 %vm4994_vm0, %v6818_v7 }
  0xb8   :  { %3802 = vmatprep.mubr.msk.f32.mxu1 %vm4994_vm0, %v6818_v7 }
  0xb9   :  { %4372 = vmatpush3.bf16.msra.mxu0 %v5181_v9 }
  0xba   :  { %4516 = vmatpush3.bf16.msra.mxu1 %v5204_v33  ;;  %4373 = vmatprep.subr.bf16.mxu0 %v6825_v26 }
  0xbb   :  { %4517 = vmatprep.subr.bf16.mxu1 %v6825_v26 }
  0xbd   :  { %4375 = vmatpush3.bf16.msra.mxu0 %v6873_v11 }
  0xbe   :  { %4519 = vmatpush3.bf16.msra.mxu1 %v6874_v31  ;;  %4376 = vmatprep.subr.bf16.mxu0 %v6825_v26 }
  0xbf   :  { %4520 = vmatprep.subr.bf16.mxu1 %v6825_v26 }
  0xc1   :  { %4378 = vmatpush3.bf16.msra.mxu0 %v6875_v36 }
  0xc2   :  { %4522 = vmatpush3.bf16.msra.mxu1 %v6876_v28  ;;  %4379 = vmatprep.subr.bf16.mxu0 %v6825_v26 }
  0xc3   :  { %4523 = vmatprep.subr.bf16.mxu1 %v6825_v26 }
  0xc5   :  { %4381 = vmatpush3.bf16.msra.mxu0 %v6877_v46 }
  0xc6   :  { %4525 = vmatpush3.bf16.msra.mxu1 %v6878_v62  ;;  %4382 = vmatprep.subr.bf16.mxu0 %v6825_v26 }
  0xc7   :  { %4526 = vmatprep.subr.bf16.mxu1 %v6825_v26 }
  0xc9   :  { %4384 = vmatpush3.bf16.msra.mxu0 %v6879_v5 }
  0xca   :  { %4528 = vmatpush3.bf16.msra.mxu1 %v6880_v63  ;;  %4385 = vmatprep.subr.bf16.mxu0 %v6825_v26 }
  0xcb   :  { %4529 = vmatprep.subr.bf16.mxu1 %v6825_v26 }
  0xcd   :  { %4387 = vmatpush3.bf16.msra.mxu0 %v6881_v54 }
  0xce   :  { %4531 = vmatpush3.bf16.msra.mxu1 %v6882_v22  ;;  %4388 = vmatprep.subr.bf16.mxu0 %v6825_v26 }
  0xcf   :  { %4532 = vmatprep.subr.bf16.mxu1 %v6825_v26 }
  0xd1   :  { %4390 = vmatpush3.bf16.msra.mxu0 %v6883_v43 }
  0xd2   :  { %4534 = vmatpush3.bf16.msra.mxu1 %v6884_v39  ;;  %4391 = vmatprep.subr.bf16.mxu0 %v6825_v26 }
  0xd3   :  { %4535 = vmatprep.subr.bf16.mxu1 %v6825_v26 }
  0xd4   :  { %3593 = vmatmul.mubr.f32.vlgmr.msra.gmra.mrb[0].mxu0 %v6885_v23 }
  0xd5   :  { %4393 = vmatpush3.bf16.msra.mxu0 %v5637_v15  ;;  %3803 = vmatmul.mubr.f32.vlgmr.msra.gmra.mrb[0].mxu1 %v6885_v23  ;;  %v6893_v15 = vld [vmem:[#allocation16_spill] sm:$0xff] }
  0xd6   :  { %4537 = vmatpush3.bf16.msra.mxu1 %v5643_v44  ;;  %4394 = vmatprep.subr.bf16.mxu0 %v6825_v26  ;;  %v300_v44 = vmul.f32 %v6893_v15, %v5851_v20 }
  0xd7   :  { %4538 = vmatprep.subr.bf16.mxu1 %v6825_v26  ;;  %3627 = vmatprep.mubr.msk.f32.mxu0 %vm4994_vm0, %v6818_v7 }
  0xd8   :  { %3837 = vmatprep.mubr.msk.f32.mxu1 %vm4994_vm0, %v6818_v7 }
  0xd9   :  { %4396 = vmatpush3.bf16.msra.mxu0 %v5650_v29  ;;  %v5872_v29 = vstv %s3040_s13 }
  0xda   :  { %4540 = vmatpush3.bf16.msra.mxu1 %v5656_v21  ;;  %4397 = vmatprep.subr.bf16.mxu0 %v6825_v26  ;;  %v353_v53 = vmul.f32 %v6895_v18, %v5872_v29 }
  0xdb   :  { %4541 = vmatprep.subr.bf16.mxu1 %v6825_v26 }
  0xdd   :  { %4399 = vmatpush3.bf16.msra.mxu0 %v5662_v50 }
  0xde   :  { %4543 = vmatpush3.bf16.msra.mxu1 %v6886_v24  ;;  %4400 = vmatprep.subr.bf16.mxu0 %v6825_v26  ;;  %v6901_v24 = vld [vmem:[#allocation24_spill] sm:$0xff] }
  0xdf   :  { %4544 = vmatprep.subr.bf16.mxu1 %v6825_v26 }
  0xe1   :  { %4402 = vmatpush3.bf16.msra.mxu0 %v6887_v8  ;;  %v304_v8 = vmul.f32 %v6901_v24, %v5851_v20 }
  0xe2   :  { %4546 = vmatpush3.bf16.msra.mxu1 %v6888_v32  ;;  %4403 = vmatprep.subr.bf16.mxu0 %v6825_v26 }
  0xe3   :  { %4547 = vmatprep.subr.bf16.mxu1 %v6825_v26 }
  0xe5   :  { %4405 = vmatpush3.bf16.msra.mxu0 %v6889_v42 }
  0xe6   :  { %4549 = vmatpush3.bf16.msra.mxu1 %v5692_v1  ;;  %4406 = vmatprep.subr.bf16.mxu0 %v6825_v26 }
  0xe7   :  { %4550 = vmatprep.subr.bf16.mxu1 %v6825_v26 }
  0xe9   :  { %4408 = vmatpush3.bf16.msra.mxu0 %v5698_v55  ;;  %v316_v55 = vadd.f32 %v300_v44, %v282_v40 }
  0xea   :  { %4552 = vmatpush3.bf16.msra.mxu1 %v5704_v48  ;;  %4409 = vmatprep.subr.bf16.mxu0 %v6825_v26  ;;  %v351_v48 = vmul.f32 %v6892_v3, %v5872_v29 }
  0xeb   :  { %4553 = vmatprep.subr.bf16.mxu1 %v6825_v26  ;;  %v1685_v49 = vand.u32 4294901760, %v316_v55 }
  0xed   :  { %4411 = vmatpush3.bf16.msra.mxu0 %v5710_v41 }
  0xee   :  { %4555 = vmatpush3.bf16.msra.mxu1 %v5712_v2  ;;  %4412 = vmatprep.subr.bf16.mxu0 %v6825_v26 }
  0xef   :  { %4556 = vmatprep.subr.bf16.mxu1 %v6825_v26 }
  0xf1   :  { %4414 = vmatpush3.bf16.msra.mxu0 %v5717_v60  ;;  %v284_v60 = vmul.f32 %v6896_v58, %v5848_v38 }
  0xf2   :  { %4558 = vmatpush3.bf16.msra.mxu1 %v5719_v56  ;;  %4415 = vmatprep.subr.bf16.mxu0 %v6825_v26  ;;  %v6897_v56 = vld [vmem:[#allocation20_spill] sm:$0xff] }
  0xf3   :  { %4559 = vmatprep.subr.bf16.mxu1 %v6825_v26  ;;  %v302_v16 = vmul.f32 %v6897_v56, %v5851_v20  ;;  %v354_v10 = vmul.f32 %v6897_v56, %v5872_v29 }
  0xf4   :  { %3628 = vmatmul.mubr.f32.vlgmr.msra.gmra.mrb[0].mxu0 %v5052_v6 }
  0xf5   :  { %4417 = vmatpush3.bf16.msra.mxu0 %v5139_v47  ;;  %3838 = vmatmul.mubr.f32.vlgmr.msra.gmra.mrb[0].mxu1 %v5052_v6  ;;  %v299_v47 = vmul.f32 %v6892_v3, %v5851_v20  ;;  %v318_v61 = vadd.f32 %v302_v16, %v284_v60 }
  0xf6   :  { %4561 = vmatpush3.bf16.msra.mxu1 %v5147_v51  ;;  %4418 = vmatprep.subr.bf16.mxu0 %v6825_v26  ;;  %v5868_v51 = vstv %s3039_s12 }
  0xf7   :  { %4562 = vmatprep.subr.bf16.mxu1 %v6825_v26  ;;  %3662 = vmatprep.mubr.msk.f32.mxu0 %vm4994_vm0, %v6818_v7  ;;  %v333_v21 = vmul.f32 %v6890_v45, %v5868_v51  ;;  %v334_v50 = vmul.f32 %v6891_v30, %v5868_v51  ;;  %v315_v1 = vadd.f32 %v299_v47, %v281_v14 }
  0xf8   :  { %3872 = vmatprep.mubr.msk.f32.mxu1 %vm4994_vm0, %v6818_v7  ;;  %v336_v4 = vmul.f32 %v6896_v58, %v5868_v51  ;;  %v337_v32 = vmul.f32 %v6898_v0, %v5868_v51  ;;  %v338_v42 = vmul.f32 %v6899_v27, %v5868_v51  ;;  %v356_v45 = vmul.f32 %v6901_v24, %v5872_v29 }
  0xf9   :  { %4420 = vmatpush3.bf16.msra.mxu0 %v5181_v9  ;;  %v352_v9 = vmul.f32 %v6893_v15, %v5872_v29  ;;  %v1682_v35 = vand.u32 4294901760, %v315_v1  ;;  %v367_v19 = vadd.f32 %v351_v48, %v333_v21  ;;  %v5934_v30 = vsub.f32 %v316_v55, %v1685_v49 }
  0xfa   :  { %4564 = vmatpush3.bf16.msra.mxu1 %v5204_v33  ;;  %4421 = vmatprep.subr.bf16.mxu0 %v6825_v26  ;;  %v6894_v33 = vld [vmem:[#allocation17_spill] sm:$0xff]  ;;  %v1691_v15 = vand.u32 4294901760, %v318_v61 }
  0xfb   :  { %4565 = vmatprep.subr.bf16.mxu1 %v6825_v26  ;;  %v283_v41 = vmul.f32 %v6894_v33, %v5848_v38  ;;  %v368_v2 = vadd.f32 %v352_v9, %v334_v50  ;;  %v335_v52 = vmul.f32 %v6894_v33, %v5868_v51  ;;  %v5910_v12 = vpack.c.bf16 %v1685_v49, %v1682_v35  ;;  %v6902_v9 = vld [vmem:[#allocation25_spill] sm:$0xff] }
  0xfc   :  { %v2330_v34 = vand.u32 4294901760, %v367_v19  ;;  %v5932_v14 = vsub.f32 %v315_v1, %v1682_v35  ;;  %v287_v1 = vmul.f32 %v6902_v9, %v5848_v38  ;;  %v5947_v33 = vadd.f32 %v356_v45, %v338_v42  ;;  %v6905_v35 = vld [vmem:[#allocation29_spill] sm:$0xff] }
  0xfd   :  { %4423 = vmatpush3.bf16.msra.mxu0 %v6873_v11  ;;  %v2333_v13 = vand.u32 4294901760, %v368_v2  ;;  %v317_v59 = vadd.f32 %v301_v17, %v283_v41  ;;  %v369_v25 = vadd.f32 %v353_v53, %v335_v52  ;;  %v286_v11 = vmul.f32 %v6899_v27, %v5848_v38  ;;  %v6903_v41 = vld [vmem:[#allocation26_spill] sm:$0xff] }
  0xfe   :  { %4567 = vmatpush3.bf16.msra.mxu1 %v6874_v31  ;;  %4424 = vmatprep.subr.bf16.mxu0 %v6825_v26  ;;  %v370_v31 = vadd.f32 %v354_v10, %v336_v4  ;;  %v5936_v40 = vsub.f32 %v367_v19, %v2330_v34  ;;  %v288_v18 = vmul.f32 %v6903_v41, %v5848_v38 }
  0xff   :  { %4568 = vmatprep.subr.bf16.mxu1 %v6825_v26  ;;  %v5938_v3 = vpack.c.bf16 %v2333_v13, %v2330_v34  ;;  %v5940_v47 = vsub.f32 %v368_v2, %v2333_v13  ;;  %v2336_v44 = vand.u32 4294901760, %v369_v25  ;;  %v320_v48 = vadd.f32 %v304_v8, %v286_v11  ;;  %v6908_v11 = vld [vmem:[#allocation33_spill] sm:$0xff] }
 0x100   :  { %v2339_v21 = vand.u32 4294901760, %v370_v31  ;;  %v306_v49 = vmul.f32 %v6905_v35, %v5851_v20  ;;  %v339_v19 = vmul.f32 %v6902_v9, %v5868_v51  ;;  %v340_v60 = vmul.f32 %v6903_v41, %v5868_v51 }
 0x101   :  { %4426 = vmatpush3.bf16.msra.mxu0 %v6875_v36  ;;  %v6900_v36 = vld [vmem:[#allocation23_spill] sm:$0xff]  ;;  %v358_v56 = vmul.f32 %v6905_v35, %v5872_v29  ;;  %v5969_v16 = vsub.f32 %v318_v61, %v1691_v15  ;;  %v5973_v53 = vsub.f32 %v369_v25, %v2336_v44  ;;  %v1697_v34 = vand.u32 4294901760, %v320_v48 }
 0x102   :  { %4570 = vmatpush3.bf16.msra.mxu1 %v6876_v28  ;;  %4427 = vmatprep.subr.bf16.mxu0 %v6825_v26  ;;  %v303_v28 = vmul.f32 %v6900_v36, %v5851_v20  ;;  %v5971_v52 = vpack.c.bf16 %v2339_v21, %v2336_v44  ;;  %v5975_v4 = vsub.f32 %v370_v31, %v2339_v21  ;;  %v6909_v31 = vld [vmem:[#allocation35_spill] sm:$0xff] }
 0x103   :  { %4571 = vmatprep.subr.bf16.mxu1 %v6825_v26  ;;  %v322_v61 = vadd.f32 %v306_v49, %v288_v18  ;;  %v5983_v27 = vadd.f32 %v358_v56, %v340_v60  ;;  %v359_v42 = vmul.f32 %v6909_v31, %v5872_v29  ;;  %v6913_v18 = vld [vmem:[#allocation37_spill] sm:$0xff]  ;;  %v6915_v49 = vld [vmem:[#allocation39_spill] sm:$0xff] }
 0x104   :  { %v319_v50 = vadd.f32 %v303_v28, %v285_v57  ;;  %6906 = vst [vmem:[#allocation28_spill] sm:$0xff] %v5971_v52  ;;  %v6907_v57 = vld [vmem:[#allocation31_spill] sm:$0xff]  ;;  %v6910_v28 = vld [vmem:[#allocation36_spill] sm:$0xff]  ;;  %v343_v56 = vmul.f32 %v6913_v18, %v5868_v51 }
 0x105   :  { %4429 = vmatpush3.bf16.msra.mxu0 %v6877_v46  ;;  %v355_v46 = vmul.f32 %v6900_v36, %v5872_v29  ;;  %v289_v25 = vmul.f32 %v6907_v57, %v5848_v38  ;;  %v307_v36 = vmul.f32 %v6909_v31, %v5851_v20  ;;  %v308_v24 = vmul.f32 %v6910_v28, %v5851_v20 }
 0x106   :  { %4573 = vmatpush3.bf16.msra.mxu1 %v6878_v62  ;;  %4430 = vmatprep.subr.bf16.mxu0 %v6825_v26  ;;  %v1688_v62 = vand.u32 4294901760, %v317_v59  ;;  %v1694_v10 = vand.u32 4294901760, %v319_v50  ;;  %v341_v8 = vmul.f32 %v6907_v57, %v5868_v51  ;;  %v1703_v9 = vand.u32 4294901760, %v322_v61 }
 0x107   :  { %4574 = vmatprep.subr.bf16.mxu1 %v6825_v26  ;;  %v371_v55 = vadd.f32 %v355_v46, %v337_v32  ;;  %v342_v32 = vmul.f32 %v6908_v11, %v5868_v51  ;;  %v360_v46 = vmul.f32 %v6910_v28, %v5872_v29 }
 0x108   :  { %v5960_v2 = vpack.c.bf16 %v1691_v15, %v1688_v62  ;;  %v5962_v58 = vsub.f32 %v317_v59, %v1688_v62  ;;  %v2345_v59 = vand.u32 4294901760, %v5947_v33  ;;  %v6002_v45 = vpack.c.bf16 %v1697_v34, %v1694_v10 }
 0x109   :  { %4432 = vmatpush3.bf16.msra.mxu0 %v6879_v5  ;;  %v6904_v5 = vld [vmem:[#allocation27_spill] sm:$0xff]  ;;  %v2342_v13 = vand.u32 4294901760, %v371_v55  ;;  %v6004_v62 = vsub.f32 %v319_v50, %v1694_v10  ;;  %v2351_v50 = vand.u32 4294901760, %v5983_v27 }
 0x10a   :  { %4576 = vmatpush3.bf16.msra.mxu1 %v6880_v63  ;;  %4433 = vmatprep.subr.bf16.mxu0 %v6825_v26  ;;  %v305_v17 = vmul.f32 %v6904_v5, %v5851_v20  ;;  %v357_v63 = vmul.f32 %v6904_v5, %v5872_v29  ;;  %6911 = vst [vmem:[#allocation30_spill] sm:$0xff] %v6002_v45 }
 0x10b   :  { %4577 = vmatprep.subr.bf16.mxu1 %v6825_v26  ;;  %v6009_v15 = vpack.c.bf16 %v2345_v59, %v2342_v13  ;;  %v6011_v44 = vsub.f32 %v371_v55, %v2342_v13  ;;  %v291_v5 = vmul.f32 %v6913_v18, %v5848_v38  ;;  %v6021_v55 = vadd.f32 %v360_v46, %v342_v32  ;;  %v6919_v32 = vld [vmem:[#allocation43_spill] sm:$0xff]  ;;  %v6920_v46 = vld [vmem:[#allocation45_spill] sm:$0xff] }
 0x10c   :  { %v373_v0 = vadd.f32 %v357_v63, %v339_v19  ;;  %v309_v19 = vmul.f32 %v6915_v49, %v5851_v20  ;;  %v6916_v63 = vld [vmem:[#allocation40_spill] sm:$0xff]  ;;  %v6043_v57 = vsub.f32 %v5947_v33, %v2345_v59  ;;  %v6922_v18 = vld [vmem:[#allocation47_spill] sm:$0xff] }
 0x10d   :  { %4435 = vmatpush3.bf16.msra.mxu0 %v6881_v54  ;;  %v321_v54 = vadd.f32 %v305_v17, %v287_v1  ;;  %6912 = vst [vmem:[#allocation32_spill] sm:$0xff] %v6009_v15  ;;  %v6914_v17 = vld [vmem:[#allocation38_spill] sm:$0xff]  ;;  %v310_v60 = vmul.f32 %v6916_v63, %v5851_v20  ;;  %v362_v13 = vmul.f32 %v6916_v63, %v5872_v29  ;;  %v2357_v59 = vand.u32 4294901760, %v6021_v55 }
 0x10e   :  { %4579 = vmatpush3.bf16.msra.mxu1 %v6882_v22  ;;  %4436 = vmatprep.subr.bf16.mxu0 %v6825_v26  ;;  %v290_v22 = vmul.f32 %v6908_v11, %v5848_v38  ;;  %v2348_v1 = vand.u32 4294901760, %v373_v0  ;;  %v292_v35 = vmul.f32 %v6914_v17, %v5848_v38  ;;  %v344_v10 = vmul.f32 %v6914_v17, %v5868_v51 }
 0x10f   :  { %4580 = vmatprep.subr.bf16.mxu1 %v6825_v26  ;;  %v1700_v21 = vand.u32 4294901760, %v321_v54  ;;  %v345_v17 = vmul.f32 %v6919_v32, %v5868_v51 }
 0x110   :  { %v324_v41 = vadd.f32 %v308_v24, %v290_v22  ;;  %v6049_v22 = vsub.f32 %v322_v61, %v1703_v9  ;;  %v6054_v31 = vpack.c.bf16 %v2351_v50, %v2348_v1  ;;  %v6064_v61 = vadd.f32 %v310_v60, %v292_v35 }
 0x111   :  { %4438 = vmatpush3.bf16.msra.mxu0 %v6883_v43  ;;  %v6006_v43 = vsub.f32 %v320_v48, %v1697_v34  ;;  %v6019_v48 = vadd.f32 %v359_v42, %v341_v8  ;;  %v361_v34 = vmul.f32 %v6915_v49, %v5872_v29  ;;  %v6047_v11 = vsub.f32 %v321_v54, %v1700_v21 }
 0x112   :  { %4582 = vmatpush3.bf16.msra.mxu1 %v6884_v39  ;;  %4583 = vmatprep.subr.bf16.mxu0 %v6825_v26  ;;  %v323_v39 = vadd.f32 %v307_v36, %v289_v25  ;;  %v6045_v25 = vpack.c.bf16 %v1703_v9, %v1700_v21  ;;  %6918 = vst [vmem:[#allocation41_spill] sm:$0xff] %v6054_v31  ;;  %v1709_v24 = vand.u32 4294901760, %v324_v41  ;;  %v6921_v9 = vld [vmem:[#allocation44_spill] sm:$0xff] }
 0x113   :  { %4727 = vmatprep.subr.bf16.mxu1 %v6825_v26  ;;  %v6056_v36 = vsub.f32 %v373_v0, %v2348_v1  ;;  %v2354_v33 = vand.u32 4294901760, %v6019_v48  ;;  %v6062_v54 = vadd.f32 %v309_v19, %v291_v5  ;;  %v6067_v8 = vadd.f32 %v361_v34, %v343_v56 }
 0x114   :  { %3663 = vmatmul.mubr.f32.vlgmr.msra.gmra.mrb[0].mxu0 %v5052_v6  ;;  %6917 = vst [vmem:[#allocation34_spill] sm:$0xff] %v6045_v25  ;;  %v1706_v28 = vand.u32 4294901760, %v323_v39  ;;  %v6069_v0 = vadd.f32 %v362_v13, %v344_v10  ;;  %v293_v42 = vmul.f32 %v6919_v32, %v5848_v38  ;;  %v311_v21 = vmul.f32 %v6920_v46, %v5851_v20  ;;  %v6927_v13 = vld [vmem:[#allocation53_spill] sm:$0xff] }
 0x115   :  { %3873 = vmatmul.mubr.f32.vlgmr.msra.gmra.mrb[0].mxu1 %v5052_v6  ;;  %4585 = vmatpush3.bf16.msra.mxu0 %v5910_v12  ;;  %v294_v1 = vmul.f32 %v6921_v9, %v5848_v38  ;;  %v312_v5 = vmul.f32 %v6922_v18, %v5851_v20  ;;  %v363_v35 = vmul.f32 %v6920_v46, %v5872_v29 }
 0x116   :  { %4729 = vmatpush3.bf16.msra.mxu1 %v5938_v3  ;;  %4586 = vmatprep.subr.bf16.mxu0 %v6825_v26  ;;  %v6085_v49 = vsub.f32 %v5983_v27, %v2351_v50  ;;  %v6087_v19 = vpack.c.bf16 %v1709_v24, %v1706_v28  ;;  %v346_v63 = vmul.f32 %v6921_v9, %v5868_v51  ;;  %v1712_v27 = vand.u32 4294901760, %v6062_v54 }
 0x117   :  { %4730 = vmatprep.subr.bf16.mxu1 %v6825_v26  ;;  %3907 = vmatprep.mubr.msk.f32.mxu0 %vm4994_vm0, %v6818_v7  ;;  %v364_v60 = vmul.f32 %v6922_v18, %v5872_v29  ;;  %v6095_v56 = vsub.f32 %v323_v39, %v1706_v28  ;;  %v6097_v10 = vsub.f32 %v324_v41, %v1709_v24  ;;  %v1715_v50 = vand.u32 4294901760, %v6064_v61  ;;  %v6925_v41 = vld [vmem:[#allocation49_spill] sm:$0xff]  ;;  %v6926_v24 = vld [vmem:[#allocation51_spill] sm:$0xff] }
 0x118   :  { %4117 = vmatprep.mubr.msk.f32.mxu1 %vm4994_vm0, %v6818_v7  ;;  %6923 = vst [vmem:[#allocation42_spill] sm:$0xff] %v6087_v19  ;;  %v6099_v34 = vpack.c.bf16 %v2357_v59, %v2354_v33  ;;  %v6763_v32 = vand.u32 4294901760, %v6069_v0  ;;  %v6106_v46 = vadd.f32 %v311_v21, %v293_v42  ;;  %v6108_v9 = vadd.f32 %v312_v5, %v294_v1  ;;  %v6928_v42 = vld [vmem:[#allocation54_spill] sm:$0xff] }
 0x119   :  { %4588 = vmatpush3.bf16.msra.mxu0 %v5960_v2  ;;  %v6110_v39 = vadd.f32 %v363_v35, %v345_v17  ;;  %v295_v28 = vmul.f32 %v6925_v41, %v5848_v38  ;;  %v296_v18 = vmul.f32 %v6926_v24, %v5848_v38  ;;  %v6117_v23 = vadd.f32 %v364_v60, %v346_v63 }
 0x11a   :  { %4732 = vmatpush3.bf16.msra.mxu1 %v5971_v52  ;;  %4589 = vmatprep.subr.bf16.mxu0 %v6825_v26  ;;  %6924 = vst [vmem:[#allocation46_spill] sm:$0xff] %v6099_v34  ;;  %v314_v21 = vmul.f32 %v6928_v42, %v5851_v20  ;;  %v347_v1 = vmul.f32 %v6925_v41, %v5868_v51  ;;  %v6764_v35 = vand.u32 4294901760, %v5932_v14  ;;  %v6765_v63 = vand.u32 4294901760, %v5934_v30 }
 0x11b   :  { %4733 = vmatprep.subr.bf16.mxu1 %v6825_v26  ;;  %v348_v38 = vmul.f32 %v6926_v24, %v5868_v51  ;;  %v365_v5 = vmul.f32 %v6927_v13, %v5872_v29  ;;  %v366_v17 = vmul.f32 %v6928_v42, %v5872_v29  ;;  %v6142_v51 = vsub.f32 %v6021_v55, %v2357_v59 }
 0x11c   :  { %v6930_v29 = vand.u32 4294901760, %v6067_v8  ;;  %v6772_v42 = vand.u32 4294901760, %v6110_v39  ;;  %v6158_v55 = vadd.f32 %v314_v21, %v296_v18  ;;  %v1776_v60 = vsub.f32 %v5932_v14, %v6764_v35 }
 0x11d   :  { %4591 = vmatpush3.bf16.msra.mxu0 %v6002_v45  ;;  %v6933_v21 = vand.u32 4294901760, %v5940_v47  ;;  %v6937_v35 = vand.u32 4294901760, %v5962_v58 }
 0x11e   :  { %4735 = vmatpush3.bf16.msra.mxu1 %v6009_v15  ;;  %4592 = vmatprep.subr.bf16.mxu0 %v6825_v26  ;;  %v313_v15 = vmul.f32 %v6927_v13, %v5851_v20  ;;  %v6136_v20 = vsub.f32 %v6019_v48, %v2354_v33  ;;  %v6144_v13 = vpack.c.bf16 %v1715_v50, %v1712_v27  ;;  %v1718_v48 = vand.u32 4294901760, %v6106_v46 }
 0x11f   :  { %4736 = vmatprep.subr.bf16.mxu1 %v6825_v26  ;;  %v6150_v24 = vpack.c.bf16 %v6763_v32, %v6930_v29  ;;  %v1721_v33 = vand.u32 4294901760, %v6108_v9  ;;  %v6163_v29 = vadd.f32 %v365_v5, %v347_v1  ;;  %v6165_v32 = vadd.f32 %v366_v17, %v348_v38 }
 0x120   :  { %6929 = vst [vmem:[#allocation48_spill] sm:$0xff] %v6144_v13  ;;  %v6156_v41 = vadd.f32 %v313_v15, %v295_v28  ;;  %v1783_v15 = vsub.f32 %v5934_v30, %v6765_v63  ;;  %v6932_v28 = vand.u32 4294901760, %v5936_v40  ;;  %v2431_v1 = vsub.f32 %v5940_v47, %v6933_v21 }
 0x121   :  { %4594 = vmatpush3.bf16.msra.mxu0 %v6045_v25  ;;  %6931 = vst [vmem:[#allocation50_spill] sm:$0xff] %v6150_v24  ;;  %v6182_v5 = vsub.f32 %v6062_v54, %v1712_v27  ;;  %v6185_v17 = vsub.f32 %v6064_v61, %v1715_v50  ;;  %v6190_v59 = vpack.c.bf16 %v1721_v33, %v1718_v48  ;;  %v6935_v54 = vand.u32 4294901760, %v6117_v23 }
 0x122   :  { %4738 = vmatpush3.bf16.msra.mxu1 %v6054_v31  ;;  %4595 = vmatprep.subr.bf16.mxu0 %v6825_v26  ;;  %v2424_v18 = vsub.f32 %v5936_v40, %v6932_v28  ;;  %v1777_v63 = vand.u32 4294901760, %v1776_v60  ;;  %v1784_v21 = vand.u32 4294901760, %v1783_v15  ;;  %v2432_v38 = vand.u32 4294901760, %v2431_v1 }
 0x123   :  { %4739 = vmatprep.subr.bf16.mxu1 %v6825_v26  ;;  %6934 = vst [vmem:[#allocation52_spill] sm:$0xff] %v6190_v59  ;;  %v6201_v61 = vpack.c.bf16 %v6935_v54, %v6772_v42  ;;  %v6939_v54 = vand.u32 4294901760, %v5973_v53  ;;  %v6940_v15 = vand.u32 4294901760, %v6067_v8  ;;  %v6942_v1 = vand.u32 4294901760, %v6158_v55 }
 0x124   :  { %v2425_v28 = vand.u32 4294901760, %v2424_v18  ;;  %v6944_v27 = vand.u32 4294901760, %v5975_v4  ;;  %v6945_v60 = vand.u32 4294901760, %v6069_v0  ;;  %v6251_v50 = vsub.f32 %v6108_v9, %v1721_v33 }
 0x125   :  { %4597 = vmatpush3.bf16.msra.mxu0 %v6087_v19  ;;  %6936 = vst [vmem:[#allocation57_spill] sm:$0xff] %v6201_v61  ;;  %v2438_v42 = vsub.f32 %v5973_v53, %v6939_v54  ;;  %v6220_v18 = vsub.f32 %v6067_v8, %v6940_v15  ;;  %v6239_v8 = vsub.f32 %v6106_v46, %v1718_v48  ;;  %v6946_v15 = vand.u32 4294901760, %v6163_v29 }
 0x126   :  { %4741 = vmatpush3.bf16.msra.mxu1 %v6099_v34  ;;  %4598 = vmatprep.subr.bf16.mxu0 %v6825_v26  ;;  %v2445_v54 = vsub.f32 %v5975_v4, %v6944_v27  ;;  %v6236_v19 = vsub.f32 %v6069_v0, %v6945_v60  ;;  %v6783_v27 = vand.u32 4294901760, %v6043_v57  ;;  %v4608_v0 = vpack.c.bf16 %v1784_v21, %v1777_v63 }
 0x127   :  { %4742 = vmatprep.subr.bf16.mxu1 %v6825_v26  ;;  %v4752_v46 = vpack.c.bf16 %v2432_v38, %v2425_v28  ;;  %v6950_v25 = vand.u32 4294901760, %v6006_v43  ;;  %v6951_v9 = vand.u32 4294901760, %v6011_v44  ;;  %v6952_v38 = vand.u32 4294901760, %v6110_v39 }
 0x128   :  { %v6955_v21 = vand.u32 4294901760, %v6047_v11 }
 0x129   :  { %4600 = vmatpush3.bf16.msra.mxu0 %v6144_v13  ;;  %v6938_v13 = vand.u32 4294901760, %v5969_v16  ;;  %v2452_v33 = vsub.f32 %v6011_v44, %v6951_v9  ;;  %v6277_v28 = vsub.f32 %v6110_v39, %v6952_v38  ;;  %v6956_v9 = vand.u32 4294901760, %v6049_v22 }
 0x12a   :  { %4744 = vmatpush3.bf16.msra.mxu1 %v6150_v24  ;;  %4601 = vmatprep.subr.bf16.mxu0 %v6825_v26  ;;  %v1790_v24 = vsub.f32 %v5962_v58, %v6937_v35  ;;  %v6941_v35 = vand.u32 4294901760, %v6156_v41 }
 0x12b   :  { %4745 = vmatprep.subr.bf16.mxu1 %v6825_v26  ;;  %v1797_v34 = vsub.f32 %v5969_v16, %v6938_v13  ;;  %v2453_v38 = vand.u32 4294901760, %v2452_v33 }
 0x12c   :  { %v6227_v13 = vpack.c.bf16 %v6942_v1, %v6941_v35  ;;  %v6947_v35 = vand.u32 4294901760, %v6165_v32  ;;  %v1791_v48 = vand.u32 4294901760, %v1790_v24  ;;  %v2459_v24 = vsub.f32 %v6043_v57, %v6783_v27 }
 0x12d   :  { %4603 = vmatpush3.bf16.msra.mxu0 %v6190_v59  ;;  %v1798_v60 = vand.u32 4294901760, %v1797_v34  ;;  %v6949_v59 = vand.u32 4294901760, %v6004_v62  ;;  %v6953_v27 = vand.u32 4294901760, %v6117_v23 }
 0x12e   :  { %6943 = vst [vmem:[#allocation58_spill] sm:$0xff] %v6227_v13  ;;  %4747 = vmatpush3.bf16.msra.mxu1 %v6201_v61  ;;  %4604 = vmatprep.subr.bf16.mxu0 %v6825_v26  ;;  %v6247_v1 = vpack.c.bf16 %v6947_v35, %v6946_v15  ;;  %v2439_v61 = vand.u32 4294901760, %v2438_v42  ;;  %v1811_v15 = vsub.f32 %v6006_v43, %v6950_v25  ;;  %v2446_v35 = vand.u32 4294901760, %v2445_v54  ;;  %v6954_v42 = vld [vmem:[#allocation56_spill] sm:$0xff] }
 0x12f   :  { %4748 = vmatprep.subr.bf16.mxu1 %v6825_v26  ;;  %v1804_v31 = vsub.f32 %v6004_v62, %v6949_v59  ;;  %v6286_v25 = vsub.f32 %v6117_v23, %v6953_v27  ;;  %v4611_v59 = vpack.c.bf16 %v1798_v60, %v1791_v48  ;;  %v1818_v54 = vsub.f32 %v6047_v11, %v6955_v21 }
 0x130   :  { %6948 = vst [vmem:[#allocation59_spill] sm:$0xff] %v6247_v1  ;;  %v1812_v63 = vand.u32 4294901760, %v1811_v15  ;;  %v4755_v39 = vpack.c.bf16 %v2446_v35, %v2439_v61  ;;  %v2460_v23 = vand.u32 4294901760, %v2459_v24  ;;  %v6959_v48 = vand.u32 4294901760, %v6095_v56 }
 0x131   :  { %4606 = vmatpush3.bf16.msra.mxu0 %v6227_v13  ;;  %v1805_v34 = vand.u32 4294901760, %v1804_v31  ;;  %v6957_v31 = vand.u32 4294901760, %v6056_v36  ;;  %v6960_v15 = vand.u32 4294901760, %v6097_v10  ;;  %v6961_v35 = vand.u32 4294901760, %v6136_v20 }
 0x132   :  { %4750 = vmatpush3.bf16.msra.mxu1 %v6247_v1  ;;  %4607 = vmatprep.subr.bf16.mxu0 %v6825_v26  ;;  %v1825_v1 = vsub.f32 %v6049_v22, %v6956_v9  ;;  %v1832_v60 = vsub.f32 %v6095_v56, %v6959_v48  ;;  %v6962_v24 = vand.u32 4294901760, %v6142_v51  ;;  %v6963_v48 = vand.u32 4294901760, %v6156_v41 }
 0x133   :  { %4751 = vmatprep.subr.bf16.mxu1 %v6825_v26  ;;  %v2466_v27 = vsub.f32 %v6056_v36, %v6957_v31  ;;  %v2480_v33 = vsub.f32 %v6136_v20, %v6961_v35  ;;  %v4614_v35 = vpack.c.bf16 %v1812_v63, %v1805_v34  ;;  %v6964_v21 = vand.u32 4294901760, %v6158_v55 }
 0x134   :  { %3908 = vmatmul.mubr.f32.vlgmr.msra.gmra.mrb[2].mxu0 %v6954_v42  ;;  %v1826_v13 = vand.u32 4294901760, %v1825_v1  ;;  %v1833_v52 = vand.u32 4294901760, %v1832_v60  ;;  %v6965_v63 = vand.u32 4294901760, %v6182_v5  ;;  %v6966_v34 = vand.u32 4294901760, %v6185_v17 }
 0x135   :  { %4609 = vmatpush3.bf16.msra.mxu0 %v4608_v0  ;;  %4118 = vmatmul.mubr.f32.vlgmr.msra.gmra.mrb[2].mxu1 %v6954_v42  ;;  %v6958_v0 = vand.u32 4294901760, %v6085_v49  ;;  %v2487_v42 = vsub.f32 %v6142_v51, %v6962_v24  ;;  %v1819_v24 = vand.u32 4294901760, %v1818_v54  ;;  %v6332_v9 = vsub.f32 %v6158_v55, %v6964_v21 }
 0x136   :  { %4753 = vmatpush3.bf16.msra.mxu1 %v4752_v46  ;;  %4610 = vmatprep.subr.bf16.mxu0 %v6825_v26  ;;  %v1839_v46 = vsub.f32 %v6097_v10, %v6960_v15  ;;  %v6327_v15 = vsub.f32 %v6156_v41, %v6963_v48  ;;  %v2467_v31 = vand.u32 4294901760, %v2466_v27  ;;  %v2481_v48 = vand.u32 4294901760, %v2480_v33 }
 0x137   :  { %v2473_v61 = vsub.f32 %v6085_v49, %v6958_v0  ;;  %4754 = vmatprep.subr.bf16.mxu1 %v6825_v26  ;;  %3942 = vmatprep.mubr.msk.f32.mxu0 %vm4994_vm0, %v6818_v7  ;;  %v4758_v0 = vpack.c.bf16 %v2460_v23, %v2453_v38  ;;  %v1846_v1 = vsub.f32 %v6182_v5, %v6965_v63  ;;  %v6967_v54 = vand.u32 4294901760, %v6220_v18 }
 0x138   :  { %4152 = vmatprep.mubr.msk.f32.mxu1 %vm4994_vm0, %v6818_v7  ;;  %v1840_v41 = vand.u32 4294901760, %v1839_v46  ;;  %v1853_v55 = vsub.f32 %v6185_v17, %v6966_v34  ;;  %v6968_v38 = vand.u32 4294901760, %v6236_v19  ;;  %v6969_v27 = vand.u32 4294901760, %v6163_v29 }
 0x139   :  { %4612 = vmatpush3.bf16.msra.mxu0 %v4611_v59  ;;  %v2474_v45 = vand.u32 4294901760, %v2473_v61  ;;  %v2488_v59 = vand.u32 4294901760, %v2487_v42  ;;  %v4617_v60 = vpack.c.bf16 %v1826_v13, %v1819_v24  ;;  %v1859_v46 = vand.u32 4294901760, %v6239_v8 }
 0x13a   :  { %4756 = vmatpush3.bf16.msra.mxu1 %v4755_v39  ;;  %4613 = vmatprep.subr.bf16.mxu0 %v6825_v26  ;;  %v2494_v39 = vsub.f32 %v6220_v18, %v6967_v54  ;;  %v2501_v23 = vsub.f32 %v6236_v19, %v6968_v38  ;;  %v6351_v61 = vsub.f32 %v6163_v29, %v6969_v27  ;;  %v1866_v33 = vand.u32 4294901760, %v6251_v50 }
 0x13b   :  { %4757 = vmatprep.subr.bf16.mxu1 %v6825_v26  ;;  %v6970_v42 = vand.u32 4294901760, %v6165_v32  ;;  %v4761_v63 = vpack.c.bf16 %v2474_v45, %v2467_v31  ;;  %v2507_v34 = vand.u32 4294901760, %v6277_v28  ;;  %v6792_v29 = vand.u32 4294901760, %v6286_v25 }
 0x13c   :  { %v4620_v13 = vpack.c.bf16 %v1840_v41, %v1833_v52  ;;  %v1847_v24 = vand.u32 4294901760, %v1846_v1  ;;  %v1854_v54 = vand.u32 4294901760, %v1853_v55  ;;  %v2495_v38 = vand.u32 4294901760, %v2494_v39 }
 0x13d   :  { %4615 = vmatpush3.bf16.msra.mxu0 %v4614_v35  ;;  %v6358_v21 = vsub.f32 %v6165_v32, %v6970_v42  ;;  %v4764_v35 = vpack.c.bf16 %v2488_v59, %v2481_v48  ;;  %v2502_v27 = vand.u32 4294901760, %v2501_v23  ;;  %v1860_v32 = vsub.f32 %v6239_v8, %v1859_v46 }
 0x13e   :  { %4759 = vmatpush3.bf16.msra.mxu1 %v4758_v0  ;;  %4616 = vmatprep.subr.bf16.mxu0 %v6825_v26  ;;  %v1867_v45 = vsub.f32 %v6251_v50, %v1866_v33  ;;  %v1873_v31 = vand.u32 4294901760, %v6327_v15  ;;  %v1880_v0 = vand.u32 4294901760, %v6332_v9  ;;  %v2508_v52 = vsub.f32 %v6277_v28, %v2507_v34 }
 0x13f   :  { %4760 = vmatprep.subr.bf16.mxu1 %v6825_v26  ;;  %v2515_v41 = vsub.f32 %v6286_v25, %v6792_v29  ;;  %v2521_v48 = vand.u32 4294901760, %v6351_v61  ;;  %v6793_v59 = vand.u32 4294901760, %v6358_v21  ;;  %v4623_v1 = vpack.c.bf16 %v1854_v54, %v1847_v24 }
 0x140   :  { %v4767_v55 = vpack.c.bf16 %v2502_v27, %v2495_v38  ;;  %v1861_v39 = vand.u32 4294901760, %v1860_v32  ;;  %v1868_v23 = vand.u32 4294901760, %v1867_v45  ;;  %v1881_v42 = vsub.f32 %v6332_v9, %v1880_v0 }
 0x141   :  { %4618 = vmatpush3.bf16.msra.mxu0 %v4617_v60  ;;  %v1874_v60 = vsub.f32 %v6327_v15, %v1873_v31  ;;  %v2516_v29 = vand.u32 4294901760, %v2515_v41  ;;  %v2522_v24 = vsub.f32 %v6351_v61, %v2521_v48 }
 0x142   :  { %4762 = vmatpush3.bf16.msra.mxu1 %v4761_v63  ;;  %4619 = vmatprep.subr.bf16.mxu0 %v6825_v26  ;;  %v2509_v63 = vand.u32 4294901760, %v2508_v52  ;;  %v4626_v54 = vpack.c.bf16 %v1868_v23, %v1861_v39  ;;  %v1882_v27 = vand.u32 4294901760, %v1881_v42  ;;  %v4779_v39 = vpack.c.bf16 %v5975_v4, %v5973_v53 }
 0x143   :  { %4763 = vmatprep.subr.bf16.mxu1 %v6825_v26  ;;  %v1875_v38 = vand.u32 4294901760, %v1874_v60  ;;  %v2523_v32 = vand.u32 4294901760, %v2522_v24  ;;  %v4638_v23 = vpack.c.bf16 %v6006_v43, %v6004_v62  ;;  %v4782_v60 = vpack.c.bf16 %v6043_v57, %v6011_v44 }
 0x144   :  { %v4641_v42 = vpack.c.bf16 %v6049_v22, %v6047_v11  ;;  %v4644_v24 = vpack.c.bf16 %v6097_v10, %v6095_v56 }
 0x145   :  { %4621 = vmatpush3.bf16.msra.mxu0 %v4620_v13  ;;  %v2529_v13 = vsub.f32 %v6358_v21, %v6793_v59  ;;  %v4629_v52 = vpack.c.bf16 %v1882_v27, %v1875_v38  ;;  %v4791_v38 = vpack.c.bf16 %v6236_v19, %v6220_v18  ;;  %v4650_v27 = vpack.c.bf16 %v6251_v50, %v6239_v8  ;;  %v6988_v59 = vld [vmem:[#allocation55_spill] sm:$0xff] }
 0x146   :  { %4765 = vmatpush3.bf16.msra.mxu1 %v4764_v35  ;;  %4622 = vmatprep.subr.bf16.mxu0 %v6825_v26  ;;  %v4770_v35 = vpack.c.bf16 %v2516_v29, %v2509_v63  ;;  %v4776_v29 = vpack.c.bf16 %v5940_v47, %v5936_v40  ;;  %v4785_v63 = vpack.c.bf16 %v6085_v49, %v6056_v36 }
 0x147   :  { %4766 = vmatprep.subr.bf16.mxu1 %v6825_v26  ;;  %v2530_v45 = vand.u32 4294901760, %v2529_v13  ;;  %v4788_v13 = vpack.c.bf16 %v6142_v51, %v6136_v20 }
 0x149   :  { %4624 = vmatpush3.bf16.msra.mxu0 %v4623_v1  ;;  %v4773_v41 = vpack.c.bf16 %v2530_v45, %v2523_v32  ;;  %v4632_v1 = vpack.c.bf16 %v5934_v30, %v5932_v14  ;;  %v4653_v32 = vpack.c.bf16 %v6332_v9, %v6327_v15  ;;  %v4797_v45 = vpack.c.bf16 %v6358_v21, %v6351_v61 }
 0x14a   :  { %4768 = vmatpush3.bf16.msra.mxu1 %v4767_v55  ;;  %4625 = vmatprep.subr.bf16.mxu0 %v6825_v26  ;;  %v4635_v55 = vpack.c.bf16 %v5969_v16, %v5962_v58  ;;  %v1676_v15 = vstv %s3042_s17 }
 0x14b   :  { %4769 = vmatprep.subr.bf16.mxu1 %v6825_v26 }
 0x14d   :  { %4627 = vmatpush3.bf16.msra.mxu0 %v4626_v54  ;;  %v4647_v54 = vpack.c.bf16 %v6185_v17, %v6182_v5 }
 0x14e   :  { %4771 = vmatpush3.bf16.msra.mxu1 %v4770_v35  ;;  %4628 = vmatprep.subr.bf16.mxu0 %v6825_v26  ;;  %v4794_v35 = vpack.c.bf16 %v6286_v25, %v6277_v28 }
 0x14f   :  { %4772 = vmatprep.subr.bf16.mxu1 %v6825_v26 }
 0x151   :  { %4630 = vmatpush3.bf16.msra.mxu0 %v4629_v52  ;;  %v6971_v52 = vld [vmem:[#allocation28_spill] sm:$0xff] }
 0x152   :  { %4774 = vmatpush3.bf16.msra.mxu1 %v4773_v41  ;;  %4631 = vmatprep.subr.bf16.mxu0 %v6825_v26  ;;  %v6973_v41 = vld [vmem:[#allocation32_spill] sm:$0xff] }
 0x153   :  { %4775 = vmatprep.subr.bf16.mxu1 %v6825_v26 }
 0x154   :  { %3943 = vmatmul.mubr.f32.vlgmr.msra.gmra.mrb[2].mxu0 %v5052_v6 }
 0x155   :  { %4633 = vmatpush3.bf16.msra.mxu0 %v4632_v1  ;;  %4153 = vmatmul.mubr.f32.vlgmr.msra.gmra.mrb[2].mxu1 %v5052_v6  ;;  %v6974_v1 = vld [vmem:[#allocation34_spill] sm:$0xff] }
 0x156   :  { %4777 = vmatpush3.bf16.msra.mxu1 %v4776_v29  ;;  %4634 = vmatprep.subr.bf16.mxu0 %v6825_v26  ;;  %v6975_v29 = vld [vmem:[#allocation41_spill] sm:$0xff] }
 0x157   :  { %4778 = vmatprep.subr.bf16.mxu1 %v6825_v26  ;;  %3977 = vmatprep.mubr.msk.f32.mxu0 %vm4994_vm0, %v6818_v7 }
 0x158   :  { %4187 = vmatprep.mubr.msk.f32.mxu1 %vm4994_vm0, %v6818_v7 }
 0x159   :  { %4636 = vmatpush3.bf16.msra.mxu0 %v4635_v55  ;;  %v6976_v55 = vld [vmem:[#allocation42_spill] sm:$0xff] }
 0x15a   :  { %4780 = vmatpush3.bf16.msra.mxu1 %v4779_v39  ;;  %4637 = vmatprep.subr.bf16.mxu0 %v6825_v26  ;;  %v6977_v39 = vld [vmem:[#allocation46_spill] sm:$0xff] }
 0x15b   :  { %4781 = vmatprep.subr.bf16.mxu1 %v6825_v26 }
 0x15d   :  { %4639 = vmatpush3.bf16.msra.mxu0 %v4638_v23  ;;  %v6978_v23 = vld [vmem:[#allocation48_spill] sm:$0xff] }
 0x15e   :  { %4783 = vmatpush3.bf16.msra.mxu1 %v4782_v60  ;;  %4640 = vmatprep.subr.bf16.mxu0 %v6825_v26  ;;  %v6979_v60 = vld [vmem:[#allocation50_spill] sm:$0xff] }
 0x15f   :  { %4784 = vmatprep.subr.bf16.mxu1 %v6825_v26 }
 0x161   :  { %4642 = vmatpush3.bf16.msra.mxu0 %v4641_v42  ;;  %v6980_v42 = vld [vmem:[#allocation52_spill] sm:$0xff] }
 0x162   :  { %4786 = vmatpush3.bf16.msra.mxu1 %v4785_v63  ;;  %4643 = vmatprep.subr.bf16.mxu0 %v6825_v26  ;;  %v6981_v63 = vld [vmem:[#allocation57_spill] sm:$0xff] }
 0x163   :  { %4787 = vmatprep.subr.bf16.mxu1 %v6825_v26 }
 0x165   :  { %4645 = vmatpush3.bf16.msra.mxu0 %v4644_v24  ;;  %v6982_v24 = vld [vmem:[#allocation58_spill] sm:$0xff] }
 0x166   :  { %4789 = vmatpush3.bf16.msra.mxu1 %v4788_v13  ;;  %4646 = vmatprep.subr.bf16.mxu0 %v6825_v26  ;;  %v6983_v13 = vand.u32 4294901760, %v5932_v14  ;;  %v6989_v14 = vand.u32 4294901760, %v5962_v58  ;;  %v6993_v58 = vand.u32 4294901760, %v6004_v62  ;;  %v6999_v62 = vand.u32 4294901760, %v6056_v36 }
 0x167   :  { %4790 = vmatprep.subr.bf16.mxu1 %v6825_v26  ;;  %v7005_v36 = vand.u32 4294901760, %v6182_v5 }
 0x169   :  { %4648 = vmatpush3.bf16.msra.mxu0 %v4647_v54  ;;  %v6984_v54 = vand.u32 4294901760, %v5934_v30  ;;  %v6990_v30 = vand.u32 4294901760, %v5969_v16  ;;  %v6994_v16 = vand.u32 4294901760, %v6006_v43  ;;  %v7000_v43 = vand.u32 4294901760, %v6085_v49 }
 0x16a   :  { %4792 = vmatpush3.bf16.msra.mxu1 %v4791_v38  ;;  %4649 = vmatprep.subr.bf16.mxu0 %v6825_v26  ;;  %v7006_v49 = vand.u32 4294901760, %v6185_v17  ;;  %v7010_v17 = vand.u32 4294901760, %v6358_v21 }
 0x16b   :  { %4793 = vmatprep.subr.bf16.mxu1 %v6825_v26  ;;  %v4680_v38 = vpack.c.bf16 %v6984_v54, %v6983_v13  ;;  %v4683_v13 = vpack.c.bf16 %v6990_v30, %v6989_v14  ;;  %v4833_v14 = vpack.c.bf16 %v7000_v43, %v6999_v62 }
 0x16c   :  { %v4845_v50 = vpack.c.bf16 %v7010_v17, %v2521_v48 }
 0x16d   :  { %4651 = vmatpush3.bf16.msra.mxu0 %v4650_v27  ;;  %v6985_v27 = vld [vmem:[#allocation59_spill] sm:$0xff] }
 0x16e   :  { %4795 = vmatpush3.bf16.msra.mxu1 %v4794_v35  ;;  %4652 = vmatprep.subr.bf16.mxu0 %v6825_v26  ;;  %v6986_v35 = vand.u32 4294901760, %v5936_v40  ;;  %v6991_v40 = vand.u32 4294901760, %v5973_v53  ;;  %v6995_v53 = vand.u32 4294901760, %v6011_v44  ;;  %v7001_v44 = vand.u32 4294901760, %v6095_v56 }
 0x16f   :  { %4796 = vmatprep.subr.bf16.mxu1 %v6825_v26  ;;  %v7007_v56 = vand.u32 4294901760, %v6220_v18 }
 0x171   :  { %4654 = vmatpush3.bf16.msra.mxu0 %v4653_v32  ;;  %v6987_v32 = vand.u32 4294901760, %v5940_v47  ;;  %v6992_v47 = vand.u32 4294901760, %v5975_v4  ;;  %v6996_v4 = vand.u32 4294901760, %v6043_v57  ;;  %v7002_v57 = vand.u32 4294901760, %v6097_v10 }
 0x172   :  { %4798 = vmatpush3.bf16.msra.mxu1 %v4797_v45  ;;  %4655 = vmatprep.subr.bf16.mxu0 %v6825_v26  ;;  %v7008_v10 = vand.u32 4294901760, %v6236_v19  ;;  %v4701_v19 = vpack.c.bf16 %v1880_v0, %v1873_v31 }
 0x173   :  { %4799 = vmatprep.subr.bf16.mxu1 %v6825_v26  ;;  %v4824_v45 = vpack.c.bf16 %v6987_v32, %v6986_v35  ;;  %v4827_v54 = vpack.c.bf16 %v6992_v47, %v6991_v40  ;;  %v6997_v35 = vand.u32 4294901760, %v6047_v11  ;;  %v6998_v32 = vand.u32 4294901760, %v6049_v22 }
 0x174   :  { %3978 = vmatmul.mubr.f32.vlgmr.msra.gmra.mrb[2].mxu0 %v5422_v37  ;;  %v4692_v30 = vpack.c.bf16 %v7002_v57, %v7001_v44  ;;  %v7003_v11 = vand.u32 4294901760, %v6136_v20  ;;  %v7004_v22 = vand.u32 4294901760, %v6142_v51  ;;  %v4695_v40 = vpack.c.bf16 %v7006_v49, %v7005_v36 }
 0x175   :  { %4657 = vmatpush3.bf16.msra.mxu0 %v5910_v12  ;;  %4188 = vmatmul.mubr.f32.vlgmr.msra.gmra.mrb[2].mxu1 %v5422_v37  ;;  %v6972_v37 = vld [vmem:[#allocation30_spill] sm:$0xff]  ;;  %v4839_v47 = vpack.c.bf16 %v7008_v10, %v7007_v56  ;;  %v4698_v20 = vpack.c.bf16 %v1866_v33, %v1859_v46  ;;  %v7009_v51 = vand.u32 4294901760, %v6286_v25  ;;  %v1029_v25 = vstv %s1028_s16 }
 0x176   :  { %4801 = vmatpush3.bf16.msra.mxu1 %v5938_v3  ;;  %4658 = vmatprep.subr.bf16.mxu0 %v6825_v26 }
 0x177   :  { %4802 = vmatprep.subr.bf16.mxu1 %v6825_v26  ;;  %4012 = vmatprep.mubr.msk.f32.mxu0 %vm4994_vm0, %v6818_v7  ;;  %v4842_v5 = vpack.c.bf16 %v7009_v51, %v2507_v34  ;;  %v2328_v34 = vstv %s3045_s19 }
 0x178   :  { %4222 = vmatprep.mubr.msk.f32.mxu1 %vm4994_vm0, %v6818_v7 }
 0x179   :  { %4660 = vmatpush3.bf16.msra.mxu0 %v5960_v2 }
 0x17a   :  { %4804 = vmatpush3.bf16.msra.mxu1 %v6971_v52  ;;  %4661 = vmatprep.subr.bf16.mxu0 %v6825_v26 }
 0x17b   :  { %4805 = vmatprep.subr.bf16.mxu1 %v6825_v26 }
 0x17d   :  { %4663 = vmatpush3.bf16.msra.mxu0 %v6972_v37 }
 0x17e   :  { %4807 = vmatpush3.bf16.msra.mxu1 %v6973_v41  ;;  %4664 = vmatprep.subr.bf16.mxu0 %v6825_v26 }
 0x17f   :  { %4808 = vmatprep.subr.bf16.mxu1 %v6825_v26 }
 0x181   :  { %4666 = vmatpush3.bf16.msra.mxu0 %v6974_v1 }
 0x182   :  { %4810 = vmatpush3.bf16.msra.mxu1 %v6975_v29  ;;  %4667 = vmatprep.subr.bf16.mxu0 %v6825_v26 }
 0x183   :  { %4811 = vmatprep.subr.bf16.mxu1 %v6825_v26 }
 0x185   :  { %4669 = vmatpush3.bf16.msra.mxu0 %v6976_v55 }
 0x186   :  { %4813 = vmatpush3.bf16.msra.mxu1 %v6977_v39  ;;  %4670 = vmatprep.subr.bf16.mxu0 %v6825_v26 }
 0x187   :  { %4814 = vmatprep.subr.bf16.mxu1 %v6825_v26 }
 0x189   :  { %4672 = vmatpush3.bf16.msra.mxu0 %v6978_v23 }
 0x18a   :  { %4816 = vmatpush3.bf16.msra.mxu1 %v6979_v60  ;;  %4673 = vmatprep.subr.bf16.mxu0 %v6825_v26 }
 0x18b   :  { %4817 = vmatprep.subr.bf16.mxu1 %v6825_v26 }
 0x18d   :  { %4675 = vmatpush3.bf16.msra.mxu0 %v6980_v42 }
 0x18e   :  { %4819 = vmatpush3.bf16.msra.mxu1 %v6981_v63  ;;  %4676 = vmatprep.subr.bf16.mxu0 %v6825_v26 }
 0x18f   :  { %4820 = vmatprep.subr.bf16.mxu1 %v6825_v26 }
 0x191   :  { %4678 = vmatpush3.bf16.msra.mxu0 %v6982_v24 }
 0x192   :  { %4822 = vmatpush3.bf16.msra.mxu1 %v6985_v27  ;;  %4679 = vmatprep.subr.bf16.mxu0 %v6825_v26 }
 0x193   :  { %4823 = vmatprep.subr.bf16.mxu1 %v6825_v26 }
 0x194   :  { %4013 = vmatmul.mubr.f32.vlgmr.msra.gmra.mrb[2].mxu0 %v6988_v59 }
 0x195   :  { %4681 = vmatpush3.bf16.msra.mxu0 %v4680_v38  ;;  %4223 = vmatmul.mubr.f32.vlgmr.msra.gmra.mrb[2].mxu1 %v6988_v59  ;;  %v4686_v59 = vpack.c.bf16 %v6994_v16, %v6993_v58  ;;  %v4830_v38 = vpack.c.bf16 %v6996_v4, %v6995_v53 }
 0x196   :  { %4825 = vmatpush3.bf16.msra.mxu1 %v4824_v45  ;;  %4682 = vmatprep.subr.bf16.mxu0 %v6825_v26  ;;  %v4689_v45 = vpack.c.bf16 %v6998_v32, %v6997_v35 }
 0x197   :  { %4826 = vmatprep.subr.bf16.mxu1 %v6825_v26  ;;  %4047 = vmatprep.mubr.msk.f32.mxu0 %vm4994_vm0, %v6818_v7 }
 0x198   :  { %4257 = vmatprep.mubr.msk.f32.mxu1 %vm4994_vm0, %v6818_v7 }
 0x199   :  { %4684 = vmatpush3.bf16.msra.mxu0 %v4683_v13  ;;  %v4836_v13 = vpack.c.bf16 %v7004_v22, %v7003_v11 }
 0x19a   :  { %4828 = vmatpush3.bf16.msra.mxu1 %v4827_v54  ;;  %4685 = vmatprep.subr.bf16.mxu0 %v6825_v26 }
 0x19b   :  { %4829 = vmatprep.subr.bf16.mxu1 %v6825_v26 }
 0x19d   :  { %4687 = vmatpush3.bf16.msra.mxu0 %v4686_v59 }
 0x19e   :  { %4831 = vmatpush3.bf16.msra.mxu1 %v4830_v38  ;;  %4688 = vmatprep.subr.bf16.mxu0 %v6825_v26 }
 0x19f   :  { %4832 = vmatprep.subr.bf16.mxu1 %v6825_v26 }
 0x1a1   :  { %4690 = vmatpush3.bf16.msra.mxu0 %v4689_v45 }
 0x1a2   :  { %4834 = vmatpush3.bf16.msra.mxu1 %v4833_v14  ;;  %4691 = vmatprep.subr.bf16.mxu0 %v6825_v26 }
 0x1a3   :  { %4835 = vmatprep.subr.bf16.mxu1 %v6825_v26 }
 0x1a5   :  { %4693 = vmatpush3.bf16.msra.mxu0 %v4692_v30 }
 0x1a6   :  { %4837 = vmatpush3.bf16.msra.mxu1 %v4836_v13  ;;  %4694 = vmatprep.subr.bf16.mxu0 %v6825_v26 }
 0x1a7   :  { %4838 = vmatprep.subr.bf16.mxu1 %v6825_v26 }
 0x1a9   :  { %4696 = vmatpush3.bf16.msra.mxu0 %v4695_v40 }
 0x1aa   :  { %4840 = vmatpush3.bf16.msra.mxu1 %v4839_v47  ;;  %4697 = vmatprep.subr.bf16.mxu0 %v6825_v26 }
 0x1ab   :  { %4841 = vmatprep.subr.bf16.mxu1 %v6825_v26 }
 0x1ad   :  { %4699 = vmatpush3.bf16.msra.mxu0 %v4698_v20 }
 0x1ae   :  { %4843 = vmatpush3.bf16.msra.mxu1 %v4842_v5  ;;  %4700 = vmatprep.subr.bf16.mxu0 %v6825_v26 }
 0x1af   :  { %4844 = vmatprep.subr.bf16.mxu1 %v6825_v26 }
 0x1b1   :  { %4702 = vmatpush3.bf16.msra.mxu0 %v4701_v19 }
 0x1b2   :  { %4846 = vmatpush3.bf16.msra.mxu1 %v4845_v50  ;;  %4703 = vmatprep.subr.bf16.mxu0 %v6825_v26 }
 0x1b3   :  { %4847 = vmatprep.subr.bf16.mxu1 %v6825_v26 }
 0x1b4   :  { %4048 = vmatmul.mubr.f32.vlgmr.msra.gmra.mrb[2].mxu0 %v5052_v6 }
 0x1b5   :  { %4705 = vmatpush3.bf16.msra.mxu0 %v5910_v12  ;;  %4258 = vmatmul.mubr.f32.vlgmr.msra.gmra.mrb[2].mxu1 %v5052_v6  ;;  %v1032_v12 = vstv %s3041_s15 }
 0x1b6   :  { %4849 = vmatpush3.bf16.msra.mxu1 %v5938_v3  ;;  %4706 = vmatprep.subr.bf16.mxu0 %v6825_v26 }
 0x1b7   :  { %4850 = vmatprep.subr.bf16.mxu1 %v6825_v26  ;;  %4082 = vmatprep.mubr.msk.f32.mxu0 %vm4994_vm0, %v6818_v7 }
 0x1b8   :  { %4292 = vmatprep.mubr.msk.f32.mxu1 %vm4994_vm0, %v6818_v7  ;;  %v385_v7 = vstv %s384_s14  ;;  %vm2984_vm0 = vcmask 523264  }
 0x1b9   :  { %4708 = vmatpush3.bf16.msra.mxu0 %v5960_v2 }
 0x1ba   :  { %4852 = vmatpush3.bf16.msra.mxu1 %v6971_v52  ;;  %4709 = vmatprep.subr.bf16.mxu0 %v6825_v26 }
 0x1bb   :  { %4853 = vmatprep.subr.bf16.mxu1 %v6825_v26 }
 0x1bd   :  { %4711 = vmatpush3.bf16.msra.mxu0 %v6972_v37  ;;  %v2324_v37 = vstv %s3044_s20 }
 0x1be   :  { %4855 = vmatpush3.bf16.msra.mxu1 %v6973_v41  ;;  %4712 = vmatprep.subr.bf16.mxu0 %v6825_v26 }
 0x1bf   :  { %4856 = vmatprep.subr.bf16.mxu1 %v6825_v26 }
 0x1c1   :  { %4714 = vmatpush3.bf16.msra.mxu0 %v6974_v1 }
 0x1c2   :  { %4858 = vmatpush3.bf16.msra.mxu1 %v6975_v29  ;;  %4715 = vmatprep.subr.bf16.mxu0 %v6825_v26 }
 0x1c3   :  { %4859 = vmatprep.subr.bf16.mxu1 %v6825_v26 }
 0x1c5   :  { %4717 = vmatpush3.bf16.msra.mxu0 %v6976_v55 }
 0x1c6   :  { %4861 = vmatpush3.bf16.msra.mxu1 %v6977_v39  ;;  %4718 = vmatprep.subr.bf16.mxu0 %v6825_v26  ;;  %v2972_v39 = vstv %s3046_s21 }
 0x1c7   :  { %4862 = vmatprep.subr.bf16.mxu1 %v6825_v26 }
 0x1c9   :  { %4720 = vmatpush3.bf16.msra.mxu0 %v6978_v23 }
 0x1ca   :  { %4864 = vmatpush3.bf16.msra.mxu1 %v6979_v60  ;;  %4721 = vmatprep.subr.bf16.mxu0 %v6825_v26 }
 0x1cb   :  { %4865 = vmatprep.subr.bf16.mxu1 %v6825_v26 }
 0x1cd   :  { %4723 = vmatpush3.bf16.msra.mxu0 %v6980_v42 }
 0x1ce   :  { %4867 = vmatpush3.bf16.msra.mxu1 %v6981_v63  ;;  %4724 = vmatprep.subr.bf16.mxu0 %v6825_v26  ;;  %v2976_v63 = vstv %s6636_s3 }
 0x1cf   :  { %4868 = vmatprep.subr.bf16.mxu1 %v6825_v26 }
 0x1d1   :  { %4726 = vmatpush3.bf16.msra.mxu0 %v6982_v24 }
 0x1d2   :  { %4870 = vmatpush3.bf16.msra.mxu1 %v6985_v27 }
 0x1d4   :  { %4083 = vmatmul.mubr.f32.vlgmr.msra.gmra.mrb[2].mxu0 %v5052_v6 }
 0x1d5   :  { %4293 = vmatmul.mubr.f32.vlgmr.msra.gmra.mrb[2].mxu1 %v5052_v6  ;;  %v1680_v6 = vstv %s3043_s18 }
 0x1e7   :  { %v1023_v3 = vpop.f32.mrb[0].mxu0 }
 0x1e8   :  { %v4871_v2 = vadd.f32 %v1023_v3, %v385_v7  ;;  %v1670_v18 = vpop.f32.mrb[0].mxu1  ;;  %v3664_v8 = vpop.f32.mrb[1].mxu0 }
 0x1e9   :  { %v4872_v26 = vadd.f32 %v1670_v18, %v1032_v12  ;;  %v3874_v28 = vpop.f32.mrb[1].mxu1 }
 0x1ea   :  { %v1027_v9 = vmax.f32 %v4871_v2, 0.0 }
 0x1eb   :  { %v1674_v61 = vmax.f32 %v4872_v26, 0.0 }
 0x1ec   :  { %v1030_v46 = vmul.f32 %v1029_v25, %v1027_v9 }
 0x1ed   :  { %v1677_v33 = vmul.f32 %v1676_v15, %v1674_v61 }
 0x1ef   :  { %v1678_v21 = vadd.f32 %v1677_v33, %v1030_v46 }
 0x2a7   :  { %v2318_v31 = vpop.f32.mrb[2].mxu0 }
 0x2a8   :  { %v4873_v0 = vadd.f32 %v2318_v31, %v1680_v6  ;;  %v2966_v48 = vpop.f32.mrb[2].mxu1  ;;  %v4084_v52 = vpop.f32.mrb[3].mxu0 }
 0x2a9   :  { %v4874_v41 = vadd.f32 %v2966_v48, %v2328_v34  ;;  %v4294_v1 = vpop.f32.mrb[3].mxu1 }
 0x2aa   :  { %v2322_v29 = vmax.f32 %v4873_v0, 0.0 }
 0x2ab   :  { %v2970_v55 = vmax.f32 %v4874_v41, 0.0 }
 0x2ac   :  { %v2325_v23 = vmul.f32 %v2324_v37, %v2322_v29 }
 0x2ad   :  { %v2973_v42 = vmul.f32 %v2972_v39, %v2970_v55 }
 0x2ae   :  { %v2326_v60 = vadd.f32 %v2325_v23, %v1678_v21 }
 0x2b0   :  { %v2974_v24 = vadd.f32 %v2973_v42, %v2326_v60 }
 0x2b2   :  { %v2977_v27 = vadd.f32 %v2976_v63, %v2974_v24 }
 0x2b4   :  { %v2978_v54 = vsub.f32 0.0, %v2977_v27 }
 0x2b6   :  { %v2979_v58 = vmul.f32 1.442695, %v2978_v54 }
 0x2b8   :  { %4922 = vpow2.f32 %v2979_v58 }
 0x2c2   :  { %v4923_v16 = vpop.eup %4922 }
 0x2c3   :  { %v2981_v59 = vadd.f32 1.0, %v4923_v16 }
 0x2c5   :  { %4924 = vrcp.f32 %v2981_v59 }
 0x2cf   :  { %v4925_v53 = vpop.eup %4924 }
 0x2d0   :  { %2985 = vst.msk [vmem:[#allocation9] sm:$0xff] %vm2984_vm0, %v4925_v53 }
 0x2d1   :  { %4973 = shalt.err (!%p4970_p5)
}
 0x2d2   :  { %s4974_s0 = scalar_lea.hbm %s6638_s5, 128 }
 0x2d3   :  { %p4975_p6 = scmp.ne.s32.totalorder %s6638_s5, %s4974_s0  ;;  %p4978_p7 = scmp.lt.u32.totalorder %s4974_s0, %s6638_s5 }
 0x2d5   :  { %p4980_p8 = pnand %p4978_p7, %p4975_p6 }
 0x2d7   :  { %4983 = shalt.err (!%p4980_p8)
}
 0x2d8   :  { %2995 = dma.vmem_to_hbm [thread:$0]  %s2993_s25, 128, %s6638_s5, [#allocation4]  }
 0x2d9   :  { %4988 = dma.done.wait [#allocation4], 128  }
 0x2da   :  { %4989 = vsyncadd [#allocation4], 4294967168 }
 0x2db   :  { %2999 = vsyncpa [#allocation4], 1 }
 0x2dc   :  { %3000 = vsyncpa [#allocation5], 1 }
 0x2dd   :  { %3001 = vsyncpa [#allocation7], 1 }

</bundles_post_ra>
